<compile_context>
chip_gen: v7x
topology: tpu7x:2x2x1
jax: 0.10.0
libtpu: 0.0.40
codegen_flags: <defaults>
</compile_context>

<pallas_src>
from functools import partial

import jax
import jax.numpy as jnp
from jax import lax
from jax.experimental import pallas as pl
from jax.experimental.pallas import tpu as pltpu


# ---------------------------------------------------------------------------
# Chip-dependent defaults.
# ---------------------------------------------------------------------------
def _tpu_defaults():
    """(is_v5e, vmem_limit_bytes) with headroom, never 100% of physical VMEM."""
    kind = ""
    try:
        kind = jax.devices()[0].device_kind.lower()
    except Exception:
        pass
    is_v5e = ("v5 lite" in kind) or ("v5e" in kind) or ("v5litepod" in kind)
    try:
        vmem_cap = int(getattr(pltpu.get_tpu_info(), "vmem_capacity_bytes",
                               64 * 1024 * 1024))
    except Exception:
        vmem_cap = 64 * 1024 * 1024          # conservative (v7x-sized) fallback
    vmem_limit = max(min(vmem_cap * 3 // 4, 100 * 1024 * 1024), 32 * 1024 * 1024)
    return is_v5e, int(vmem_limit)


# ---------------------------------------------------------------------------
# Kernel: one (batch, H-tile, OC-tile) grid step of the 3x3 'same' conv.
# ---------------------------------------------------------------------------
def _conv3x3_tap_kernel(x_ref, xh_ref, w_ref, o_ref):
    """x_ref : (TH, W+2, C)   bf16  main input rows (already zero-padded in W)
       xh_ref: (2,  W+2, C)   bf16  2-row bottom halo
       w_ref : (3, 3, C, TOC) bf16  HWIO weight tile
       o_ref : (TH, W, TOC)   bf16  conv output tile
    """
    th, w_out, toc = o_ref.shape
    c = x_ref.shape[-1]

    # (TH+2, W+2, C) working tile = main rows + bottom halo.  Concatenation is
    # along the leading (untiled) axis -> plain vreg-block copy, no relayout.
    x = jnp.concatenate([x_ref[...], xh_ref[...]], axis=0)

    # 9 accumulating K=C tap matmuls (no materialized im2col).  Each tap is a
    # plain 2-D MXU contraction with f32 accumulation.
    acc = jnp.zeros((th * w_out, toc), jnp.float32)
    for dh in range(3):
        for dw in range(3):
            lhs = x[dh:dh + th, dw:dw + w_out, :].reshape(th * w_out, c)
            acc = acc + lax.dot_general(
                lhs, w_ref[dh, dw],
                dimension_numbers=(((1,), (0,)), ((), ())),
                preferred_element_type=jnp.float32)

    o_ref[...] = acc.reshape(th, w_out, toc).astype(o_ref.dtype)


# ---------------------------------------------------------------------------
# Wrapper: tiled pallas_call for the conv.
# ---------------------------------------------------------------------------
def conv3x3_same_nhwc(x_nhwc, w_hwio, *, th=None, toc=None):
    """x_nhwc: (B, H, W, C) bf16, w_hwio: (3, 3, C, OC) bf16 -> (B, H, W, OC) bf16."""
    B, H, W, C = x_nhwc.shape
    OC = w_hwio.shape[-1]
    is_v5e, vmem_limit = _tpu_defaults()

    # OC (lane) tiling: lane-dense when OC allows it, no padding / post-slice.
    if toc is None:
        if OC % 256 == 0 and not is_v5e:
            toc = 256          # 256-wide MXU on v6e/v7x
        elif OC % 128 == 0:
            toc = 128          # v5e: N=128 already gives full MXU fill
        else:
            toc = OC           # small OC: keep TOC=OC, accept masked stores
    assert OC % toc == 0 and (toc % 128 == 0 or toc == OC), (OC, toc)

    # H (spatial) tiling.  32 rows is sized for v7x's 64 MiB VMEM at production
    # W/C.  TODO(synk): sweep TH upward (and optionally pl.Buffered(3) on the
    # main input spec) on v6e/v5e, which have 2x the VMEM of v7x.
    if th is None:
        th = next((t for t in (32, 16, 8) if H % t == 0), H)
    assert H % th == 0 and th % 2 == 0, (H, th)

    # Spatial halo pad once in HBM: (B, H+2, W+2, C).
    x_pad = jnp.pad(x_nhwc, ((0, 0), (1, 1), (1, 1), (0, 0)))

    grid = (B, H // th, OC // toc)   # OC innermost -> input reused per OC sweep

    out = pl.pallas_call(
        _conv3x3_tap_kernel,
        out_shape=jax.ShapeDtypeStruct((B, H, W, OC), jnp.bfloat16),
        grid_spec=pltpu.PrefetchScalarGridSpec(
            num_scalar_prefetch=0,
            grid=grid,
            in_specs=[
                # Main TH rows: padded rows [h*TH, h*TH+TH).  Block index is
                # independent of j -> fetched once per (b, h-tile).
                pl.BlockSpec((None, th, W + 2, C),
                             lambda b, h, j: (b, h, 0, 0)),
                # 2-row bottom halo: padded rows [(h+1)*TH, (h+1)*TH+2).
                pl.BlockSpec((None, 2, W + 2, C),
                             lambda b, h, j: (b, (h + 1) * (th // 2), 0, 0)),
                # One OC tile of the HWIO weight slab.
                pl.BlockSpec((3, 3, C, toc),
                             lambda b, h, j: (0, 0, 0, j)),
            ],
            out_specs=pl.BlockSpec((None, th, W, toc),
                                   lambda b, h, j: (b, h, 0, j)),
        ),
        compiler_params=pltpu.CompilerParams(
            dimension_semantics=("parallel", "parallel", "parallel"),
            vmem_limit_bytes=vmem_limit,
        ),
    )(x_pad, x_pad, w_hwio)   # same padded array feeds main + halo specs
    return out


# ---------------------------------------------------------------------------
# PixelShuffle glue (single fused XLA reshape/transpose pass each way).
# ---------------------------------------------------------------------------
def pixel_shuffle_nhwc_to_nchw(y_nhwc, r=2):
    """PixelShuffle(r), PyTorch channel order; NHWC conv output -> NCHW result."""
    B, H, W, OC = y_nhwc.shape
    oc = OC // (r * r)
    y = y_nhwc.reshape(B, H, W, oc, r, r)
    y = jnp.transpose(y, (0, 3, 1, 4, 2, 5))     # (B, oc, H, r, W, r)
    return y.reshape(B, oc, H * r, W * r)


@partial(jax.jit, static_argnames=("th", "toc"))
def upsample_forward(x_nchw, w_oihw, th=None, toc=None):
    """Upsample.forward: conv3x3 (Pallas, bf16 MXU / f32 acc) + PixelShuffle(2)."""
    # NCHW contract of the PyTorch module.  TODO(synk): in an NHWC end-to-end
    # pipeline the layout passes below (and the PixelShuffle pass) fuse away;
    # with an NCHW output contract exactly one fused XLA layout pass over the
    # output is unavoidable, so the sub-pixel scatter is left to that single
    # pass rather than re-interleaved inside the kernel (which would also drop
    # the store lane-width to OC/4 and re-mask every vst).
    x_nhwc = jnp.transpose(x_nchw.astype(jnp.bfloat16), (0, 2, 3, 1))   # NCHW->NHWC
    w_hwio = jnp.transpose(w_oihw.astype(jnp.bfloat16), (2, 3, 1, 0))   # OIHW->HWIO
    y_nhwc = conv3x3_same_nhwc(x_nhwc, w_hwio, th=th, toc=toc)          # bf16
    out = pixel_shuffle_nhwc_to_nchw(y_nhwc, r=2)
    return out.astype(jnp.float32)


# ---------------------------------------------------------------------------
# Reference (bf16-rounded operands, f32 conv, PyTorch PixelShuffle semantics).
# ---------------------------------------------------------------------------
def _reference(x_nchw, w_oihw, r=2):
    x32 = x_nchw.astype(jnp.bfloat16).astype(jnp.float32)
    w32 = w_oihw.astype(jnp.bfloat16).astype(jnp.float32)
    conv = lax.conv_general_dilated(
        x32, w32, window_strides=(1, 1), padding=((1, 1), (1, 1)),
        dimension_numbers=("NCHW", "OIHW", "NCHW"))
    B, C2, H, W = conv.shape
    oc = C2 // (r * r)
    y = conv.reshape(B, oc, r, r, H, W)
    y = jnp.transpose(y, (0, 1, 4, 2, 5, 3))     # (B, oc, H, r, W, r)
    return y.reshape(B, oc, H * r, W * r)


if __name__ == "__main__":
    def check(B, C, H, W, seed=0, **kw):
        key = jax.random.PRNGKey(seed)
        kx, kwt = jax.random.split(key)
        x = jax.random.normal(kx, (B, C, H, W), dtype=jnp.float32)
        # Conv2d weight (out_ch, in_ch, kh, kw) = (2*n_feat, n_feat, 3, 3)
        w = jax.random.normal(kwt, (2 * C, C, 3, 3), dtype=jnp.float32) * 0.1

        out = jax.block_until_ready(upsample_forward(x, w, **kw))
        assert out.shape == (B, C // 2, 2 * H, 2 * W), out.shape

        ref = _reference(x, w)
        err = float(jnp.max(jnp.abs(out - ref)))
        # Kernel stores bf16 (review item) -> allow one bf16 rounding of the
        # f32-accumulated result on top of MXU-vs-XLA accumulation order.
        assert err < 2e-2, (err, (B, C, H, W))

    # Canonical small config: n_feat=4 -> conv 4->8 channels, PixelShuffle(2)
    # gives 2 output channels at 2x spatial resolution.
    check(B=2, C=4, H=16, W=16)
    # Exercise the multi-H-tile path (halo carried across spatial tiles).
    check(B=1, C=8, H=32, W=16, th=8)

    print("KERNEL_OK")
</pallas_src>

<mosaic_0001>
module attributes {stable_mosaic.version = 11 : i64} {
  func.func @_conv3x3_tap_kernel(%arg0: i32, %arg1: i32, %arg2: i32, %arg3: memref<1x16x18x4xbf16, #tpu.memory_space<vmem>>, %arg4: memref<1x2x18x4xbf16, #tpu.memory_space<vmem>>, %arg5: memref<3x3x4x8xbf16, #tpu.memory_space<vmem>>, %arg6: memref<1x16x16x8xbf16, #tpu.memory_space<vmem>>) attributes {dimension_semantics = [#tpu.dimension_semantics<parallel>, #tpu.dimension_semantics<parallel>, #tpu.dimension_semantics<parallel>], iteration_bounds = array<i64: 2, 1, 1>, scalar_prefetch = 0 : i64, scratch_operands = 0 : i64, tpu.core_type = #tpu.core_type<tc>, window_params = [{transform_indices = @transform_0, window_bounds = array<i64: 1, 16, 18, 4>}, {transform_indices = @transform_1, window_bounds = array<i64: 1, 2, 18, 4>}, {transform_indices = @transform_2, window_bounds = array<i64: 3, 3, 4, 8>}, {transform_indices = @transform_3, window_bounds = array<i64: 1, 16, 16, 8>}]} {
    %c0 = arith.constant 0 : index
    %c0_0 = arith.constant 0 : index
    %c0_1 = arith.constant 0 : index
    %c0_2 = arith.constant 0 : index
    %0 = vector.load %arg3[%c0, %c0_0, %c0_1, %c0_2] : memref<1x16x18x4xbf16, #tpu.memory_space<vmem>>, vector<1x16x18x4xbf16>
    %1 = vector.shape_cast %0 : vector<1x16x18x4xbf16> to vector<16x18x4xbf16>
    %c0_3 = arith.constant 0 : index
    %c0_4 = arith.constant 0 : index
    %c0_5 = arith.constant 0 : index
    %c0_6 = arith.constant 0 : index
    %2 = vector.load %arg4[%c0_3, %c0_4, %c0_5, %c0_6] : memref<1x2x18x4xbf16, #tpu.memory_space<vmem>>, vector<1x2x18x4xbf16>
    %3 = vector.shape_cast %2 : vector<1x2x18x4xbf16> to vector<2x18x4xbf16>
    %4 = tpu.concatenate %1, %3 in 0 : vector<16x18x4xbf16>, vector<2x18x4xbf16> -> vector<18x18x4xbf16>
    %cst = arith.constant 0.000000e+00 : f32
    %5 = vector.broadcast %cst : f32 to vector<256x8xf32>
    %6 = vector.extract_strided_slice %4 {offsets = [0, 0, 0], sizes = [16, 16, 4], strides = [1, 1, 1]} : vector<18x18x4xbf16> to vector<16x16x4xbf16>
    %7 = vector.shape_cast %6 : vector<16x16x4xbf16> to vector<256x4xbf16>
    %c0_7 = arith.constant 0 : index
    %c0_8 = arith.constant 0 : index
    %c0_9 = arith.constant 0 : index
    %c0_10 = arith.constant 0 : index
    %8 = vector.load %arg5[%c0_7, %c0_8, %c0_9, %c0_10] : memref<3x3x4x8xbf16, #tpu.memory_space<vmem>>, vector<1x1x4x8xbf16>
    %9 = vector.shape_cast %8 : vector<1x1x4x8xbf16> to vector<4x8xbf16>
    %cst_11 = arith.constant dense<0.000000e+00> : vector<256x8xf32>
    %10 = tpu.matmul %7, %9, %cst_11 {dimension_numbers = #tpu.dot_dimension_numbers<[1], [0], [0], [1], [0, 0, 1, 1], [], []>} : vector<256x4xbf16>, vector<4x8xbf16>, vector<256x8xf32> -> vector<256x8xf32>
    %11 = arith.addf %5, %10 : vector<256x8xf32>
    %12 = vector.extract_strided_slice %4 {offsets = [0, 1, 0], sizes = [16, 16, 4], strides = [1, 1, 1]} : vector<18x18x4xbf16> to vector<16x16x4xbf16>
    %13 = vector.shape_cast %12 : vector<16x16x4xbf16> to vector<256x4xbf16>
    %c0_12 = arith.constant 0 : index
    %c1 = arith.constant 1 : index
    %c0_13 = arith.constant 0 : index
    %c0_14 = arith.constant 0 : index
    %14 = vector.load %arg5[%c0_12, %c1, %c0_13, %c0_14] : memref<3x3x4x8xbf16, #tpu.memory_space<vmem>>, vector<1x1x4x8xbf16>
    %15 = vector.shape_cast %14 : vector<1x1x4x8xbf16> to vector<4x8xbf16>
    %cst_15 = arith.constant dense<0.000000e+00> : vector<256x8xf32>
    %16 = tpu.matmul %13, %15, %cst_15 {dimension_numbers = #tpu.dot_dimension_numbers<[1], [0], [0], [1], [0, 0, 1, 1], [], []>} : vector<256x4xbf16>, vector<4x8xbf16>, vector<256x8xf32> -> vector<256x8xf32>
    %17 = arith.addf %11, %16 : vector<256x8xf32>
    %18 = vector.extract_strided_slice %4 {offsets = [0, 2, 0], sizes = [16, 16, 4], strides = [1, 1, 1]} : vector<18x18x4xbf16> to vector<16x16x4xbf16>
    %19 = vector.shape_cast %18 : vector<16x16x4xbf16> to vector<256x4xbf16>
    %c0_16 = arith.constant 0 : index
    %c2 = arith.constant 2 : index
    %c0_17 = arith.constant 0 : index
    %c0_18 = arith.constant 0 : index
    %20 = vector.load %arg5[%c0_16, %c2, %c0_17, %c0_18] : memref<3x3x4x8xbf16, #tpu.memory_space<vmem>>, vector<1x1x4x8xbf16>
    %21 = vector.shape_cast %20 : vector<1x1x4x8xbf16> to vector<4x8xbf16>
    %cst_19 = arith.constant dense<0.000000e+00> : vector<256x8xf32>
    %22 = tpu.matmul %19, %21, %cst_19 {dimension_numbers = #tpu.dot_dimension_numbers<[1], [0], [0], [1], [0, 0, 1, 1], [], []>} : vector<256x4xbf16>, vector<4x8xbf16>, vector<256x8xf32> -> vector<256x8xf32>
    %23 = arith.addf %17, %22 : vector<256x8xf32>
    %24 = vector.extract_strided_slice %4 {offsets = [1, 0, 0], sizes = [16, 16, 4], strides = [1, 1, 1]} : vector<18x18x4xbf16> to vector<16x16x4xbf16>
    %25 = vector.shape_cast %24 : vector<16x16x4xbf16> to vector<256x4xbf16>
    %c1_20 = arith.constant 1 : index
    %c0_21 = arith.constant 0 : index
    %c0_22 = arith.constant 0 : index
    %c0_23 = arith.constant 0 : index
    %26 = vector.load %arg5[%c1_20, %c0_21, %c0_22, %c0_23] : memref<3x3x4x8xbf16, #tpu.memory_space<vmem>>, vector<1x1x4x8xbf16>
    %27 = vector.shape_cast %26 : vector<1x1x4x8xbf16> to vector<4x8xbf16>
    %cst_24 = arith.constant dense<0.000000e+00> : vector<256x8xf32>
    %28 = tpu.matmul %25, %27, %cst_24 {dimension_numbers = #tpu.dot_dimension_numbers<[1], [0], [0], [1], [0, 0, 1, 1], [], []>} : vector<256x4xbf16>, vector<4x8xbf16>, vector<256x8xf32> -> vector<256x8xf32>
    %29 = arith.addf %23, %28 : vector<256x8xf32>
    %30 = vector.extract_strided_slice %4 {offsets = [1, 1, 0], sizes = [16, 16, 4], strides = [1, 1, 1]} : vector<18x18x4xbf16> to vector<16x16x4xbf16>
    %31 = vector.shape_cast %30 : vector<16x16x4xbf16> to vector<256x4xbf16>
    %c1_25 = arith.constant 1 : index
    %c1_26 = arith.constant 1 : index
    %c0_27 = arith.constant 0 : index
    %c0_28 = arith.constant 0 : index
    %32 = vector.load %arg5[%c1_25, %c1_26, %c0_27, %c0_28] : memref<3x3x4x8xbf16, #tpu.memory_space<vmem>>, vector<1x1x4x8xbf16>
    %33 = vector.shape_cast %32 : vector<1x1x4x8xbf16> to vector<4x8xbf16>
    %cst_29 = arith.constant dense<0.000000e+00> : vector<256x8xf32>
    %34 = tpu.matmul %31, %33, %cst_29 {dimension_numbers = #tpu.dot_dimension_numbers<[1], [0], [0], [1], [0, 0, 1, 1], [], []>} : vector<256x4xbf16>, vector<4x8xbf16>, vector<256x8xf32> -> vector<256x8xf32>
    %35 = arith.addf %29, %34 : vector<256x8xf32>
    %36 = vector.extract_strided_slice %4 {offsets = [1, 2, 0], sizes = [16, 16, 4], strides = [1, 1, 1]} : vector<18x18x4xbf16> to vector<16x16x4xbf16>
    %37 = vector.shape_cast %36 : vector<16x16x4xbf16> to vector<256x4xbf16>
    %c1_30 = arith.constant 1 : index
    %c2_31 = arith.constant 2 : index
    %c0_32 = arith.constant 0 : index
    %c0_33 = arith.constant 0 : index
    %38 = vector.load %arg5[%c1_30, %c2_31, %c0_32, %c0_33] : memref<3x3x4x8xbf16, #tpu.memory_space<vmem>>, vector<1x1x4x8xbf16>
    %39 = vector.shape_cast %38 : vector<1x1x4x8xbf16> to vector<4x8xbf16>
    %cst_34 = arith.constant dense<0.000000e+00> : vector<256x8xf32>
    %40 = tpu.matmul %37, %39, %cst_34 {dimension_numbers = #tpu.dot_dimension_numbers<[1], [0], [0], [1], [0, 0, 1, 1], [], []>} : vector<256x4xbf16>, vector<4x8xbf16>, vector<256x8xf32> -> vector<256x8xf32>
    %41 = arith.addf %35, %40 : vector<256x8xf32>
    %42 = vector.extract_strided_slice %4 {offsets = [2, 0, 0], sizes = [16, 16, 4], strides = [1, 1, 1]} : vector<18x18x4xbf16> to vector<16x16x4xbf16>
    %43 = vector.shape_cast %42 : vector<16x16x4xbf16> to vector<256x4xbf16>
    %c2_35 = arith.constant 2 : index
    %c0_36 = arith.constant 0 : index
    %c0_37 = arith.constant 0 : index
    %c0_38 = arith.constant 0 : index
    %44 = vector.load %arg5[%c2_35, %c0_36, %c0_37, %c0_38] : memref<3x3x4x8xbf16, #tpu.memory_space<vmem>>, vector<1x1x4x8xbf16>
    %45 = vector.shape_cast %44 : vector<1x1x4x8xbf16> to vector<4x8xbf16>
    %cst_39 = arith.constant dense<0.000000e+00> : vector<256x8xf32>
    %46 = tpu.matmul %43, %45, %cst_39 {dimension_numbers = #tpu.dot_dimension_numbers<[1], [0], [0], [1], [0, 0, 1, 1], [], []>} : vector<256x4xbf16>, vector<4x8xbf16>, vector<256x8xf32> -> vector<256x8xf32>
    %47 = arith.addf %41, %46 : vector<256x8xf32>
    %48 = vector.extract_strided_slice %4 {offsets = [2, 1, 0], sizes = [16, 16, 4], strides = [1, 1, 1]} : vector<18x18x4xbf16> to vector<16x16x4xbf16>
    %49 = vector.shape_cast %48 : vector<16x16x4xbf16> to vector<256x4xbf16>
    %c2_40 = arith.constant 2 : index
    %c1_41 = arith.constant 1 : index
    %c0_42 = arith.constant 0 : index
    %c0_43 = arith.constant 0 : index
    %50 = vector.load %arg5[%c2_40, %c1_41, %c0_42, %c0_43] : memref<3x3x4x8xbf16, #tpu.memory_space<vmem>>, vector<1x1x4x8xbf16>
    %51 = vector.shape_cast %50 : vector<1x1x4x8xbf16> to vector<4x8xbf16>
    %cst_44 = arith.constant dense<0.000000e+00> : vector<256x8xf32>
    %52 = tpu.matmul %49, %51, %cst_44 {dimension_numbers = #tpu.dot_dimension_numbers<[1], [0], [0], [1], [0, 0, 1, 1], [], []>} : vector<256x4xbf16>, vector<4x8xbf16>, vector<256x8xf32> -> vector<256x8xf32>
    %53 = arith.addf %47, %52 : vector<256x8xf32>
    %54 = vector.extract_strided_slice %4 {offsets = [2, 2, 0], sizes = [16, 16, 4], strides = [1, 1, 1]} : vector<18x18x4xbf16> to vector<16x16x4xbf16>
    %55 = vector.shape_cast %54 : vector<16x16x4xbf16> to vector<256x4xbf16>
    %c2_45 = arith.constant 2 : index
    %c2_46 = arith.constant 2 : index
    %c0_47 = arith.constant 0 : index
    %c0_48 = arith.constant 0 : index
    %56 = vector.load %arg5[%c2_45, %c2_46, %c0_47, %c0_48] : memref<3x3x4x8xbf16, #tpu.memory_space<vmem>>, vector<1x1x4x8xbf16>
    %57 = vector.shape_cast %56 : vector<1x1x4x8xbf16> to vector<4x8xbf16>
    %cst_49 = arith.constant dense<0.000000e+00> : vector<256x8xf32>
    %58 = tpu.matmul %55, %57, %cst_49 {dimension_numbers = #tpu.dot_dimension_numbers<[1], [0], [0], [1], [0, 0, 1, 1], [], []>} : vector<256x4xbf16>, vector<4x8xbf16>, vector<256x8xf32> -> vector<256x8xf32>
    %59 = arith.addf %53, %58 : vector<256x8xf32>
    %60 = vector.shape_cast %59 : vector<256x8xf32> to vector<16x16x8xf32>
    %61 = arith.truncf %60 : vector<16x16x8xf32> to vector<16x16x8xbf16>
    %c0_50 = arith.constant 0 : index
    %c0_51 = arith.constant 0 : index
    %c0_52 = arith.constant 0 : index
    %c0_53 = arith.constant 0 : index
    %62 = vector.load %arg6[%c0_50, %c0_51, %c0_52, %c0_53] : memref<1x16x16x8xbf16, #tpu.memory_space<vmem>>, vector<1x16x16x8xbf16>
    %63 = vector.shape_cast %62 : vector<1x16x16x8xbf16> to vector<16x16x8xbf16>
    %64 = vector.shape_cast %61 : vector<16x16x8xbf16> to vector<1x16x16x8xbf16>
    tpu.vector_store %arg6[%c0_50, %c0_51, %c0_52, %c0_53], %64 {strides = array<i32>} : memref<1x16x16x8xbf16, #tpu.memory_space<vmem>>, vector<1x16x16x8xbf16>,
    return
  }
  func.func @transform_0(%arg0: i32, %arg1: i32, %arg2: i32) -> (i32, i32, i32, i32) {
    %c0_i32 = arith.constant 0 : i32
    %c0_i32_0 = arith.constant 0 : i32
    %c0_i32_1 = arith.constant 0 : i32
    return %arg0, %arg1, %c0_i32, %c0_i32_0 : i32, i32, i32, i32
  }
  func.func @transform_1(%arg0: i32, %arg1: i32, %arg2: i32) -> (i32, i32, i32, i32) {
    %c1_i32 = arith.constant 1 : i32
    %0 = arith.addi %arg1, %c1_i32 : i32
    %c8_i32 = arith.constant 8 : i32
    %1 = arith.muli %0, %c8_i32 : i32
    %c0_i32 = arith.constant 0 : i32
    %c0_i32_0 = arith.constant 0 : i32
    %c0_i32_1 = arith.constant 0 : i32
    return %arg0, %1, %c0_i32, %c0_i32_0 : i32, i32, i32, i32
  }
  func.func @transform_2(%arg0: i32, %arg1: i32, %arg2: i32) -> (i32, i32, i32, i32) {
    %c0_i32 = arith.constant 0 : i32
    %c0_i32_0 = arith.constant 0 : i32
    %c0_i32_1 = arith.constant 0 : i32
    %c0_i32_2 = arith.constant 0 : i32
    return %c0_i32, %c0_i32_0, %c0_i32_1, %arg2 : i32, i32, i32, i32
  }
  func.func @transform_3(%arg0: i32, %arg1: i32, %arg2: i32) -> (i32, i32, i32, i32) {
    %c0_i32 = arith.constant 0 : i32
    %c0_i32_0 = arith.constant 0 : i32
    return %arg0, %arg1, %c0_i32, %arg2 : i32, i32, i32, i32
  }
}

</mosaic_0001>

<bundles_post_ra>
// kernel: upsample_forward.1
= control target key start
LH: loop header
LB: loop body
LE: loop exit
PB: predicated region body
PF: predicated region fallthrough
CT: control target
= control target key end

     0   :  { %s4470_s12 = smov 0   ;;  %s4472_s13 = smov 0   ;;  %s5531_s0 = inlined_call_operand.vmem [shape: bf16[2,18,18,4], index: 0, kind: input, shape index: {}, may-alias: {0,1}]   ;;  %s5532_s1 = inlined_call_operand.vmem [shape: bf16[2,18,18,4], index: 1, kind: input, shape index: {}, may-alias: {0,1}]   ;;  %s5533_s2 = inlined_call_operand.vmem [shape: bf16[3,3,4,8], index: 2, kind: input, shape index: {}]   ;;  %s5534_s3 = inlined_call_operand.vmem [shape: bf16[2,16,16,8], index: 3, kind: output, shape index: {}]  }
   0x1   :  { %s4474_s14 = smov 0  }
   0x2 LB: > { %s32_s15 = sadd.s32 1, %s4444_s13  ;;  %p3352_p0 = scmp.ge.s32.totalorder %s4448_s14, 1  ;;  %s4448_s14 = sphi %s4474_s14, %s13_s14   ;;  %s4444_s13 = sphi %s4472_s13, %s5613_s13   ;;  %s4440_s12 = sphi %s4470_s12, %s5612_s12  }
   0x3   : > { %p34_p1 = scmp.ge.s32.totalorder %s32_s15, 2  ;;  %p213_p2 = scmp.lt.s32.totalorder %s4448_s14, 3 }
   0x5   : > { %s5615_s15 = smov (%p34_p1, %s32_s15), 0  ;;  %p214_p3 = pnand %p3352_p0, %p213_p2 }
   0x7   : > { %217 = sbr.rel (%p214_p3) target bundleno = 552 (0x228), region = 32 }
   0xe   : > { %v3357_v0 = vld [vmem:[%s5533_s2 + $0x2] sm:$0x3]  ;;  %vm867_vm0 = vcmask 1041408   ;;  %v3489_v1 = vld [vmem:[%s5533_s2 + $0x8] sm:$0x3]  ;;  %p277_p4 = scmp.lt.s32.totalorder %s4440_s12, 1 }
   0xf   : > { %4367 = vmatprep.subr.msk.bf16.mxu1 %vm867_vm0, %v3357_v0  ;;  %4371 = vmatprep.subr.msk.bf16.mxu0 %vm867_vm0, %v3489_v1  ;;  %v869_v2 = vsel %vm867_vm0, %v3357_v0, 0  ;;  %v4498_v3 = vsel %vm867_vm0, %v3489_v1, 0  ;;  %v380_v4 = vld [vmem:[%s5533_s2] sm:$0x3]  ;;  %v3508_v5 = vld [vmem:[%s5533_s2 + $0xa] sm:$0x3] }
  0x10   : > { %5566 = vst [vmem:[#allocation2_spill] sm:$0xff] %v4498_v3  ;;  %3804 = vmatpush3.bf16.msra.mxu1 %v869_v2  ;;  %3940 = vmatpush3.bf16.msra.mxu0 %v4498_v3  ;;  %s5617_s12 = smov (!%p277_p4, %s4440_s12), 1  ;;  %vm381_vm1 = vsmask.f32 3328  ;;  %vm382_vm2 = vsmask.f32 7440 }
  0x11   : > { %4368 = vmatprep.subr.msk.bf16.mxu1 %vm867_vm0, %v380_v4  ;;  %4373 = vmatprep.subr.msk.bf16.mxu0 %vm867_vm0, %v3508_v5  ;;  %s4377_s24 = smul.u32 216, %s5617_s12  ;;  %v4520_v6 = vsel %vm867_vm0, %v380_v4, 0  ;;  %v4523_v7 = vsel %vm867_vm0, %v3508_v5, 0  ;;  %v4528_v8 = vld [vmem:[%s5533_s2 + $0xc] sm:$0x3]  ;;  %vm818_vm3 = vcmask 31744   ;;  %vm4564_vm4 = vmor %vm381_vm1, %vm382_vm2 }
  0x12   : > { %v4552_v20 = vsel %vm867_vm0, %v4528_v8, 0  ;;  %vm1340_vm5 = vcmask 1042432   ;;  %vm1341_vm6 = vcmask 1046532   ;;  %s3617_s21 = sshll.u32 %s5617_s12, 7  ;;  %vm3169_vm8 = vcmask 60416  }
  0x13   : > { %s4517_s27 = scalar_lea.vmem %s5531_s0, %s4377_s24  ;;  %vm4745_vm7 = vmor %vm1340_vm5, %vm1341_vm6  ;;  %s3616_s9 = sadd.s32 192, %s4377_s24 }
  0x14   : > { %v4531_v9 = vld [vmem:[%s4517_s27] sm:$0xf]  ;;  %v4534_v10 = vld [vmem:[%s4517_s27 + $0x4] sm:$0xf]  ;;  %v328_v11 = vld [vmem:[%s4517_s27 + $0x8] sm:$0x1]  ;;  %s5113_s16 = scalar_lea.vmem %s5532_s1, %s3616_s9  ;;  %s5456_s24 = scalar_lea.vmem %s5534_s3, %s3617_s21 }
  0x15   : > { %v385_v12 = vshrl.u32 %v4531_v9, 16  ;;  %v388_v13 = vshll.u32 %v4531_v9, 16  ;;  %v394_v14 = vshll.u32 %v4534_v10, 16  ;;  %v398_v15 = vshrl.u32 %v4534_v10, 16  ;;  %v4542_v16 = vld [vmem:[%s4517_s27 + $0xc] sm:$0xf] }
  0x16   : > { %v404_v17 = vshll.u32 %v328_v11, 16  ;;  %v4545_v18 = vld [vmem:[%s4517_s27 + $0x10] sm:$0xf]  ;;  %v4548_v19 = vld [vmem:[%s4517_s27 + $0x14] sm:$0x1]  ;;  %v409_v26 = vshrl.u32 %v4542_v16, 16 }
  0x17   : > { %v387_v21 = vrot.slane %v385_v12, 4  ;;  %v390_v22 = vrot.slane %v388_v13, 5  ;;  %v396_v23 = vrot.slane %v394_v14, 5  ;;  %v400_v24 = vrot.slane %v398_v15, 4  ;;  %v4560_v33 = vld [vmem:[%s4517_s27 + $0x18] sm:$0xf] }
  0x18   : > { %v406_v25 = vrot.slane %v404_v17, 5  ;;  %v412_v27 = vshll.u32 %v4542_v16, 16  ;;  %v418_v28 = vshll.u32 %v4545_v18, 16  ;;  %v422_v31 = vshrl.u32 %v4545_v18, 16  ;;  %v4573_v39 = vld [vmem:[%s4517_s27 + $0x1c] sm:$0xf] }
  0x19   : > { %v391_v29 = vor.u32 %v390_v22, %v387_v21  ;;  %v401_v30 = vor.u32 %v400_v24, %v396_v23  ;;  %v428_v32 = vshll.u32 %v4548_v19, 16  ;;  %v411_v35 = vrot.slane %v409_v26, 4  ;;  %v4577_v46 = vld [vmem:[%s4517_s27 + $0x20] sm:$0x1]  ;;  %v4587_v57 = vld [vmem:[%s4517_s27 + $0x24] sm:$0xf] }
  0x1a   : > { %v414_v36 = vrot.slane %v412_v27, 5  ;;  %v420_v37 = vrot.slane %v418_v28, 5  ;;  %v4570_v38 = vcombine.low %v4542_v16, %v4545_v18  ;;  %v424_v42 = vrot.slane %v422_v31, 4  ;;  %v4592_v62 = vld [vmem:[%s4517_s27 + $0x28] sm:$0xf] }
  0x1b   : > { %v392_v40 = vrot.slane %v391_v29, 4  ;;  %v402_v41 = vrot.slane %v401_v30, 4  ;;  %v430_v43 = vrot.slane %v428_v32, 5  ;;  %v1355_v45 = vrot.slane %v4548_v19, 5  ;;  %v4600_v4 = vld [vmem:[%s4517_s27 + $0x2c] sm:$0x1] }
  0x1c   : > { %v415_v44 = vor.u32 %v414_v36, %v411_v35  ;;  %v433_v47 = vshrl.u32 %v4560_v33, 16  ;;  %v436_v48 = vshll.u32 %v4560_v33, 16  ;;  %v425_v51 = vor.u32 %v424_v42, %v420_v37  ;;  %v4606_v14 = vld [vmem:[%s4517_s27 + $0x30] sm:$0xf]  ;;  %v4618_v28 = vld [vmem:[%s4517_s27 + $0x34] sm:$0xf] }
  0x1d   : > { %v397_v49 = vsel %vm4564_vm4, %v392_v40, %v396_v23  ;;  %v407_v50 = vsel %vm4564_vm4, %v402_v41, %v406_v25  ;;  %v442_v52 = vshll.u32 %v4573_v39, 16  ;;  %v446_v60 = vshrl.u32 %v4573_v39, 16  ;;  %v4613_v23 = vld [vmem:[%s5533_s2 + $0x4] sm:$0x3]  ;;  %v4625_v32 = vld [vmem:[%s4517_s27 + $0x38] sm:$0x1] }
  0x1e   : > { %v3358_v53 = vcombine.low %v397_v49, %v407_v50  ;;  %v416_v54 = vrot.slane %v415_v44, 4  ;;  %v435_v55 = vrot.slane %v433_v47, 4  ;;  %v438_v56 = vrot.slane %v436_v48, 5  ;;  %v4633_v48 = vld [vmem:[%s4517_s27 + $0x3c] sm:$0xf] }
  0x1f   : > { %v426_v58 = vrot.slane %v425_v51, 4  ;;  %v444_v59 = vrot.slane %v442_v52, 5  ;;  %v452_v61 = vshll.u32 %v4577_v46, 16  ;;  %v1359_v1 = vrot.slane %v4573_v39, 5  ;;  %v4641_v52 = vld [vmem:[%s4517_s27 + $0x40] sm:$0xf] }
  0x20   : > { %3805 = vmatprep.mubr.msk.bf16.mxu1 %vm818_vm3, %v3358_v53  ;;  %v421_v63 = vsel %vm4564_vm4, %v416_v54, %v420_v37  ;;  %v439_v0 = vor.u32 %v438_v56, %v435_v55  ;;  %v1362_v2 = vrot.slane %v4577_v46, 5  ;;  %v448_v11 = vrot.slane %v446_v60, 4 }
  0x21   : > { %v431_v5 = vsel %vm4564_vm4, %v426_v58, %v430_v43  ;;  %v454_v12 = vrot.slane %v452_v61, 5  ;;  %v457_v13 = vshrl.u32 %v4587_v57, 16  ;;  %v460_v21 = vshll.u32 %v4587_v57, 16 }
  0x22   : > { %v3359_v15 = vcombine.low %v421_v63, %v431_v5  ;;  %v440_v17 = vrot.slane %v439_v0, 4  ;;  %v466_v22 = vshll.u32 %v4592_v62, 16  ;;  %v449_v24 = vor.u32 %v448_v11, %v444_v59  ;;  %v4653_v5 = vld [vmem:[%s4517_s27 + $0x44] sm:$0x1] }
  0x23   : > { %v459_v25 = vrot.slane %v457_v13, 4  ;;  %v470_v26 = vshrl.u32 %v4592_v62, 16  ;;  %v476_v27 = vshll.u32 %v4600_v4, 16  ;;  %v462_v30 = vrot.slane %v460_v21, 5  ;;  %v4658_v13 = vld [vmem:[%s4517_s27 + $0x48] sm:$0xf] }
  0x24   : > { %3941 = vmatprep.mubr.msk.bf16.mxu0 %vm818_vm3, %v3359_v15  ;;  %3806 = vmatmul.mubr.msk.bf16.vlgmr.msra.gmra.mrb[0].mxu1 %vm818_vm3, %v3359_v15  ;;  %v445_v29 = vsel %vm4564_vm4, %v440_v17, %v444_v59  ;;  %v468_v31 = vrot.slane %v466_v22, 5  ;;  %v481_v35 = vshrl.u32 %v4606_v14, 16  ;;  %v450_v36 = vrot.slane %v449_v24, 4  ;;  %v4665_v24 = vld [vmem:[%s4517_s27 + $0x4c] sm:$0xf] }
  0x25   : > { %3838 = vmatpush3.bf16.msra.mxu1 %v4520_v6  ;;  %v472_v37 = vrot.slane %v470_v26, 4  ;;  %v478_v40 = vrot.slane %v476_v27, 5  ;;  %v484_v41 = vshll.u32 %v4606_v14, 16  ;;  %v463_v42 = vor.u32 %v462_v30, %v459_v25 }
  0x26   : > { %v483_v43 = vrot.slane %v481_v35, 4  ;;  %v490_v44 = vshll.u32 %v4618_v28, 16  ;;  %v494_v47 = vshrl.u32 %v4618_v28, 16  ;;  %4369 = vmatprep.subr.msk.bf16.mxu1 %vm867_vm0, %v4613_v23  ;;  %v455_v49 = vsel %vm4564_vm4, %v450_v36, %v454_v12 }
  0x27   : > { %v473_v6 = vor.u32 %v472_v37, %v468_v31  ;;  %v486_v50 = vrot.slane %v484_v41, 5  ;;  %v500_v51 = vshll.u32 %v4625_v32, 16  ;;  %v4643_v53 = vcombine.low %v445_v29, %v455_v49 }
  0x28   : > { %v464_v54 = vrot.slane %v463_v42, 4  ;;  %v492_v55 = vrot.slane %v490_v44, 5  ;;  %v496_v56 = vrot.slane %v494_v47, 4  ;;  %v505_v61 = vshrl.u32 %v4633_v48, 16  ;;  %v4687_v42 = vld [vmem:[%s4517_s27 + $0x54] sm:$0xf] }
  0x29   : > { %5569 = vst [vmem:[#allocation3_spill] sm:$0xff] %v4643_v53  ;;  %v474_v58 = vrot.slane %v473_v6, 4  ;;  %v487_v59 = vor.u32 %v486_v50, %v483_v43  ;;  %v502_v60 = vrot.slane %v500_v51, 5  ;;  %3942 = vmatmul.mubr.msk.bf16.vlgmr.msra.gmra.mrb[0].mxu0 %vm818_vm3, %v4643_v53  ;;  %3809 = vmatprep.mubr.msk.bf16.mxu1 %vm818_vm3, %v4643_v53  ;;  %v508_v11 = vshll.u32 %v4633_v48, 16  ;;  %5571 = vst [vmem:[#allocation5_spill] sm:$0xff] %v4687_v42 }
  0x2a   : > { %v469_v63 = vsel %vm4564_vm4, %v464_v54, %v468_v31  ;;  %v497_v0 = vor.u32 %v496_v56, %v492_v55  ;;  %v514_v12 = vshll.u32 %v4641_v52, 16  ;;  %3974 = vmatpush3.bf16.msra.mxu0 %v4523_v7  ;;  %v507_v21 = vrot.slane %v505_v61, 4  ;;  %v4692_v6 = vld [vmem:[%s4517_s27 + $0x58] sm:$0xf] }
  0x2b   : > { %v479_v15 = vsel %vm4564_vm4, %v474_v58, %v478_v40  ;;  %v488_v17 = vrot.slane %v487_v59, 4  ;;  %v518_v22 = vshrl.u32 %v4641_v52, 16  ;;  %v510_v27 = vrot.slane %v508_v11, 5  ;;  %4374 = vmatprep.subr.msk.bf16.mxu0 %vm867_vm0, %v4528_v8  ;;  %v4682_v8 = vld [vmem:[%s4517_s27 + $0x50] sm:$0x1] }
  0x2c   : > { %v4667_v25 = vcombine.low %v469_v63, %v479_v15  ;;  %v498_v26 = vrot.slane %v497_v0, 4  ;;  %v516_v29 = vrot.slane %v514_v12, 5  ;;  %v524_v31 = vshll.u32 %v4653_v5, 16  ;;  %v4705_v11 = vld [vmem:[%s4517_s27 + $0x5c] sm:$0x1] }
  0x2d   : > { %v493_v7 = vsel %vm4564_vm4, %v488_v17, %v492_v55  ;;  %v520_v30 = vrot.slane %v518_v22, 4  ;;  %v529_v35 = vshrl.u32 %v4658_v13, 16  ;;  %v511_v37 = vor.u32 %v510_v27, %v507_v21  ;;  %v4709_v15 = vld [vmem:[%s4517_s27 + $0x60] sm:$0xf]  ;;  %v4714_v27 = vld [vmem:[%s4517_s27 + $0x64] sm:$0xf] }
  0x2e   : > { %5570 = vst [vmem:[#allocation4_spill] sm:$0xff] %v4667_v25  ;;  %3945 = vmatprep.mubr.msk.bf16.mxu0 %vm818_vm3, %v4667_v25  ;;  %3810 = vmatmul.mubr.msk.bf16.gmra.mrb[4].mxu1 %vm818_vm3, %v4667_v25  ;;  %v503_v36 = vsel %vm4564_vm4, %v498_v26, %v502_v60  ;;  %v532_v40 = vshll.u32 %v4658_v13, 16  ;;  %v538_v41 = vshll.u32 %v4665_v24, 16  ;;  %v526_v47 = vrot.slane %v524_v31, 5  ;;  %v4926_v25 = vld [vmem:[%s4517_s27 + $0xa8] sm:$0xf] }
  0x2f   : > { %v4689_v43 = vcombine.low %v493_v7, %v503_v36  ;;  %v521_v44 = vor.u32 %v520_v30, %v516_v29  ;;  %v531_v49 = vrot.slane %v529_v35, 4  ;;  %v512_v50 = vrot.slane %v511_v37, 4 }
  0x30   : > { %v534_v51 = vrot.slane %v532_v40, 5  ;;  %v540_v54 = vrot.slane %v538_v41, 5  ;;  %v542_v55 = vshrl.u32 %v4665_v24, 16  ;;  %v548_v58 = vshll.u32 %v4682_v8, 16 }
  0x31   : > { %5572 = vst [vmem:[#allocation6_spill] sm:$0xff] %v4689_v43  ;;  %3813 = vmatprep.mubr.msk.bf16.mxu1 %vm818_vm3, %v4689_v43  ;;  %v522_v56 = vrot.slane %v521_v44, 4  ;;  %v553_v59 = vshrl.u32 %v4687_v42, 16  ;;  %v556_v60 = vshll.u32 %v4687_v42, 16  ;;  %3946 = vmatmul.mubr.msk.bf16.gmra.mrb[4].mxu0 %vm818_vm3, %v4689_v43  ;;  %v517_v61 = vsel %vm4564_vm4, %v512_v50, %v516_v29 }
  0x32   : > { %v535_v63 = vor.u32 %v534_v51, %v531_v49  ;;  %v544_v0 = vrot.slane %v542_v55, 4  ;;  %v562_v12 = vshll.u32 %v4692_v6, 16  ;;  %v550_v21 = vrot.slane %v548_v58, 5 }
  0x33   : > { %v527_v17 = vsel %vm4564_vm4, %v522_v56, %v526_v47  ;;  %v555_v22 = vrot.slane %v553_v59, 4  ;;  %v558_v26 = vrot.slane %v556_v60, 5  ;;  %v566_v36 = vshrl.u32 %v4692_v6, 16  ;;  %v4728_v47 = vld [vmem:[%s4517_s27 + $0x68] sm:$0x1] }
  0x34   : > { %v4716_v7 = vcombine.low %v517_v61, %v527_v17  ;;  %v536_v29 = vrot.slane %v535_v63, 4  ;;  %v545_v30 = vor.u32 %v544_v0, %v540_v54  ;;  %v564_v31 = vrot.slane %v562_v12, 5 }
  0x35   : > { %v559_v35 = vor.u32 %v558_v26, %v555_v22  ;;  %v572_v37 = vshll.u32 %v4705_v11, 16  ;;  %v577_v40 = vshrl.u32 %v4709_v15, 16  ;;  %v580_v49 = vshll.u32 %v4709_v15, 16 }
  0x36   : > { %5573 = vst [vmem:[#allocation7_spill] sm:$0xff] %v4716_v7  ;;  %3949 = vmatprep.mubr.msk.bf16.mxu0 %vm818_vm3, %v4716_v7  ;;  %3814 = vmatmul.mubr.msk.bf16.gmra.mrb[8].mxu1 %vm818_vm3, %v4716_v7  ;;  %v541_v41 = vsel %vm4564_vm4, %v536_v29, %v540_v54  ;;  %v546_v44 = vrot.slane %v545_v30, 4  ;;  %v586_v50 = vshll.u32 %v4714_v27, 16  ;;  %v568_v55 = vrot.slane %v566_v36, 4  ;;  %v4736_v54 = vld [vmem:[%s4517_s27 + $0x6c] sm:$0xf] }
  0x37   : > { %v560_v51 = vrot.slane %v559_v35, 4  ;;  %v574_v56 = vrot.slane %v572_v37, 5  ;;  %v579_v58 = vrot.slane %v577_v40, 4  ;;  %v582_v60 = vrot.slane %v580_v49, 5  ;;  %v4752_v36 = vld [vmem:[%s4517_s27 + $0x70] sm:$0xf] }
  0x38   : > { %v551_v59 = vsel %vm4564_vm4, %v546_v44, %v550_v21  ;;  %v588_v61 = vrot.slane %v586_v50, 5  ;;  %v590_v63 = vshrl.u32 %v4714_v27, 16  ;;  %v569_v17 = vor.u32 %v568_v55, %v564_v31  ;;  %v4903_v7 = vld [vmem:[%s4517_s27 + $0xa0] sm:$0xf] }
  0x39   : > { %v4738_v0 = vcombine.low %v541_v41, %v551_v59  ;;  %v565_v12 = vsel %vm4564_vm4, %v560_v51, %v564_v31  ;;  %v596_v22 = vshll.u32 %v4728_v47, 16  ;;  %v583_v21 = vor.u32 %v582_v60, %v579_v58  ;;  %v4765_v51 = vld [vmem:[%s4517_s27 + $0x74] sm:$0x1] }
  0x3a   : > { %v592_v29 = vrot.slane %v590_v63, 4  ;;  %v3423_v30 = vrot.slane %v4542_v16, 9  ;;  %v1352_v35 = vrot.slane %v4545_v18, 5  ;;  %v570_v31 = vrot.slane %v569_v17, 4 }
  0x3b   : > { %5574 = vst [vmem:[#allocation8_spill] sm:$0xff] %v4738_v0  ;;  %3950 = vmatmul.mubr.msk.bf16.gmra.mrb[8].mxu0 %vm818_vm3, %v4738_v0  ;;  %3817 = vmatprep.mubr.msk.bf16.mxu1 %vm818_vm3, %v4738_v0  ;;  %v598_v37 = vrot.slane %v596_v22, 5  ;;  %v601_v40 = vshrl.u32 %v4736_v54, 16  ;;  %v604_v41 = vshll.u32 %v4736_v54, 16  ;;  %v584_v44 = vrot.slane %v583_v21, 4 }
  0x3c   : > { %v593_v49 = vor.u32 %v592_v29, %v588_v61  ;;  %v1353_v16 = vsel %vm4745_vm7, %v3423_v30, %v1352_v35  ;;  %v1354_v18 = vrot.slane %v1352_v35, 4  ;;  %v575_v50 = vsel %vm4564_vm4, %v570_v31, %v574_v56  ;;  %v4777_v56 = vld [vmem:[%s4517_s27 + $0x78] sm:$0xf]  ;;  %v4793_v31 = vld [vmem:[%s4517_s27 + $0x7c] sm:$0xf] }
  0x3d   : > { %v603_v55 = vrot.slane %v601_v40, 4  ;;  %v606_v58 = vrot.slane %v604_v41, 5  ;;  %v610_v59 = vshll.u32 %v4752_v36, 16  ;;  %v4768_v60 = vcombine.low %v565_v12, %v575_v50 }
  0x3e   : > { %v589_v63 = vsel %vm4564_vm4, %v584_v44, %v588_v61  ;;  %v594_v17 = vrot.slane %v593_v49, 4  ;;  %v1356_v22 = vsel %vm4745_vm7, %v1354_v18, %v1355_v45  ;;  %v614_v35 = vshrl.u32 %v4752_v36, 16  ;;  %v4798_v49 = vld [vmem:[%s4517_s27 + $0x80] sm:$0x1] }
  0x3f   : > { %5577 = vst [vmem:[#allocation9_spill] sm:$0xff] %v4768_v60  ;;  %v4779_v21 = vcombine.low %v1353_v16, %v1356_v22  ;;  %v607_v29 = vor.u32 %v606_v58, %v603_v55  ;;  %v612_v30 = vrot.slane %v610_v59, 5  ;;  %3953 = vmatprep.mubr.msk.bf16.mxu0 %vm818_vm3, %v4768_v60  ;;  %3818 = vmatmul.mubr.msk.bf16.gmra.mrb[12].mxu1 %vm818_vm3, %v4768_v60  ;;  %v620_v45 = vshll.u32 %v4765_v51, 16  ;;  %v4896_v60 = vld [vmem:[%s4517_s27 + $0x9c] sm:$0xf] }
  0x40   : > { %v599_v19 = vsel %vm4564_vm4, %v594_v17, %v598_v37  ;;  %v3424_v61 = vrot.slane %v4560_v33, 9  ;;  %v1361_v12 = vrot.slane %v1359_v1, 4  ;;  %v616_v44 = vrot.slane %v614_v35, 4 }
  0x41   : > { %5578 = vst [vmem:[#allocation10_spill] sm:$0xff] %v4779_v21  ;;  %v4795_v40 = vcombine.low %v589_v63, %v599_v19  ;;  %v608_v41 = vrot.slane %v607_v29, 4  ;;  %v625_v16 = vshrl.u32 %v4777_v56, 16  ;;  %v622_v18 = vrot.slane %v620_v45, 5  ;;  %v4824_v29 = vld [vmem:[%s4517_s27 + $0x84] sm:$0xf] }
  0x42   : > { %v1360_v37 = vsel %vm4745_vm7, %v3424_v61, %v1359_v1  ;;  %v1363_v50 = vsel %vm4745_vm7, %v1361_v12, %v1362_v2  ;;  %v628_v55 = vshll.u32 %v4777_v56, 16  ;;  %v617_v59 = vor.u32 %v616_v44, %v612_v30 }
  0x43   : > { %5579 = vst [vmem:[#allocation11_spill] sm:$0xff] %v4795_v40  ;;  %3954 = vmatmul.mubr.msk.bf16.gmra.mrb[12].mxu0 %vm818_vm3, %v4795_v40  ;;  %3821 = vmatprep.mubr.msk.bf16.mxu1 %vm818_vm3, %v4795_v40  ;;  %v613_v58 = vsel %vm4564_vm4, %v608_v41, %v612_v30  ;;  %v4816_v63 = vcombine.low %v1360_v37, %v1363_v50  ;;  %v627_v1 = vrot.slane %v625_v16, 4  ;;  %v634_v2 = vshll.u32 %v4793_v31, 16  ;;  %v4830_v16 = vld [vmem:[%s4517_s27 + $0x88] sm:$0xf] }
  0x44   : > { %3975 = vmatprep.mubr.msk.bf16.mxu0 %vm818_vm3, %v4779_v21  ;;  %v630_v46 = vrot.slane %v628_v55, 5  ;;  %v638_v17 = vshrl.u32 %v4793_v31, 16  ;;  %v644_v22 = vshll.u32 %v4798_v49, 16  ;;  %v618_v35 = vrot.slane %v617_v59, 4 }
  0x45   : > { %5580 = vst [vmem:[#allocation12_spill] sm:$0xff] %v4816_v63  ;;  %v3425_v30 = vrot.slane %v4587_v57, 9  ;;  %v1366_v19 = vrot.slane %v4592_v62, 5  ;;  %v1369_v45 = vrot.slane %v4600_v4, 5  ;;  %v636_v12 = vrot.slane %v634_v2, 5 }
  0x46   : > { %v631_v61 = vor.u32 %v630_v46, %v627_v1  ;;  %v640_v41 = vrot.slane %v638_v17, 4  ;;  %v646_v44 = vrot.slane %v644_v22, 5  ;;  %v623_v37 = vsel %vm4564_vm4, %v618_v35, %v622_v18  ;;  %v4840_v1 = vld [vmem:[%s4517_s27 + $0x8c] sm:$0x1] }
  0x47   : > { %v1367_v50 = vsel %vm4745_vm7, %v3425_v30, %v1366_v19  ;;  %v1368_v55 = vrot.slane %v1366_v19, 4  ;;  %v649_v59 = vshrl.u32 %v4824_v29, 16  ;;  %v4837_v3 = vcombine.low %v613_v58, %v623_v37 }
  0x48   : > { %v632_v40 = vrot.slane %v631_v61, 4  ;;  %v641_v4 = vor.u32 %v640_v41, %v636_v12  ;;  %v652_v46 = vshll.u32 %v4824_v29, 16  ;;  %v658_v18 = vshll.u32 %v4830_v16, 16  ;;  %v4854_v61 = vld [vmem:[%s4517_s27 + $0x90] sm:$0xf] }
  0x49   : > { %5581 = vst [vmem:[#allocation13_spill] sm:$0xff] %v4837_v3  ;;  %v1370_v2 = vsel %vm4745_vm7, %v1368_v55, %v1369_v45  ;;  %v651_v17 = vrot.slane %v649_v59, 4  ;;  %v662_v22 = vshrl.u32 %v4830_v16, 16  ;;  %3822 = vmatmul.mubr.msk.bf16.gmra.mrb[16].mxu1 %vm818_vm3, %v4837_v3  ;;  %v4859_v45 = vld [vmem:[%s5533_s2 + $0xe] sm:$0x3]  ;;  %v1373_v59 = vrot.slane %v4618_v28, 5 }
  0x4a   : > { %v637_v58 = vsel %vm4564_vm4, %v632_v40, %v636_v12  ;;  %v642_v35 = vrot.slane %v641_v4, 4  ;;  %v4851_v30 = vcombine.low %v1367_v50, %v1370_v2  ;;  %v654_v19 = vrot.slane %v652_v46, 5  ;;  %5583 = vst [vmem:[#allocation15_spill] sm:$0xff] %v4859_v45  ;;  %v4873_v46 = vld [vmem:[%s4517_s27 + $0x94] sm:$0xf] }
  0x4b   : > { %3976 = vmatmul.mubr.msk.bf16.vlgmr.msra.gmra.mrb[0].mxu0 %vm818_vm3, %v4816_v63  ;;  %v660_v41 = vrot.slane %v658_v18, 5  ;;  %v664_v37 = vrot.slane %v662_v22, 4  ;;  %v668_v40 = vshll.u32 %v4840_v1, 16  ;;  %v3426_v12 = vrot.slane %v4606_v14, 9  ;;  %v4878_v3 = vld [vmem:[%s4517_s27 + $0x98] sm:$0x1] }
  0x4c   : > { %5582 = vst [vmem:[#allocation14_spill] sm:$0xff] %v4851_v30  ;;  %4008 = vmatpush3.bf16.msra.mxu0 %v4552_v20  ;;  %v647_v50 = vsel %vm4564_vm4, %v642_v35, %v646_v44  ;;  %3979 = vmatprep.mubr.msk.bf16.mxu0 %vm818_vm3, %v4851_v30  ;;  %v655_v55 = vor.u32 %v654_v19, %v651_v17  ;;  %v1376_v4 = vrot.slane %v4625_v32, 5  ;;  %v673_v20 = vshrl.u32 %v4854_v61, 16 }
  0x4d   : > { %v4875_v2 = vcombine.low %v637_v58, %v647_v50  ;;  %v665_v18 = vor.u32 %v664_v37, %v660_v41  ;;  %v670_v22 = vrot.slane %v668_v40, 5  ;;  %4375 = vmatprep.subr.msk.bf16.mxu0 %vm867_vm0, %v4859_v45  ;;  %v1374_v17 = vsel %vm4745_vm7, %v3426_v12, %v1373_v59 }
  0x4e   : > { %v656_v44 = vrot.slane %v655_v55, 4  ;;  %v1375_v35 = vrot.slane %v1373_v59, 4  ;;  %v676_v32 = vshll.u32 %v4854_v61, 16  ;;  %v675_v19 = vrot.slane %v673_v20, 4 }
  0x4f   : > { %5584 = vst [vmem:[#allocation16_spill] sm:$0xff] %v4875_v2  ;;  %3825 = vmatprep.mubr.msk.bf16.mxu1 %vm818_vm3, %v4875_v2  ;;  %v666_v58 = vrot.slane %v665_v18, 4  ;;  %v682_v37 = vshll.u32 %v4873_v46, 16  ;;  %v686_v40 = vshrl.u32 %v4873_v46, 16  ;;  %v692_v59 = vshll.u32 %v4878_v3, 16 }
  0x50   : > { %v661_v50 = vsel %vm4564_vm4, %v656_v44, %v660_v41  ;;  %v1377_v55 = vsel %vm4745_vm7, %v1375_v35, %v1376_v4  ;;  %v678_v12 = vrot.slane %v676_v32, 5  ;;  %v3427_v4 = vrot.slane %v4633_v48, 9 }
  0x51   : > { %v671_v2 = vsel %vm4564_vm4, %v666_v58, %v670_v22  ;;  %v4900_v18 = vcombine.low %v1374_v17, %v1377_v55  ;;  %v684_v20 = vrot.slane %v682_v37, 5  ;;  %v688_v0 = vrot.slane %v686_v40, 4  ;;  %v4916_v58 = vld [vmem:[%s4517_s27 + $0xa4] sm:$0x1] }
  0x52   : > { %v4905_v43 = vcombine.low %v661_v50, %v671_v2  ;;  %v679_v41 = vor.u32 %v678_v12, %v675_v19  ;;  %v694_v44 = vrot.slane %v692_v59, 5  ;;  %v1380_v32 = vrot.slane %v4641_v52, 5 }
  0x53   : > { %5585 = vst [vmem:[#allocation17_spill] sm:$0xff] %v4900_v18  ;;  %3980 = vmatmul.mubr.msk.bf16.gmra.mrb[4].mxu0 %vm818_vm3, %v4900_v18  ;;  %v689_v35 = vor.u32 %v688_v0, %v684_v20  ;;  %v1383_v22 = vrot.slane %v4653_v5, 5  ;;  %v697_v17 = vshrl.u32 %v4896_v60, 16  ;;  %v700_v19 = vshll.u32 %v4896_v60, 16 }
  0x54   : > { %5586 = vst [vmem:[#allocation18_spill] sm:$0xff] %v4905_v43  ;;  %3826 = vmatmul.mubr.msk.bf16.gmra.mrb[20].mxu1 %vm818_vm3, %v4905_v43  ;;  %v680_v2 = vrot.slane %v679_v41, 4  ;;  %v706_v37 = vshll.u32 %v4903_v7, 16  ;;  %v710_v0 = vshrl.u32 %v4903_v7, 16  ;;  %v1381_v5 = vsel %vm4745_vm7, %v3427_v4, %v1380_v32 }
  0x55   : > { %v690_v40 = vrot.slane %v689_v35, 4  ;;  %v1382_v50 = vrot.slane %v1380_v32, 4  ;;  %v699_v55 = vrot.slane %v697_v17, 4  ;;  %v702_v59 = vrot.slane %v700_v19, 5  ;;  %v4935_v32 = vld [vmem:[%s4517_s27 + $0xac] sm:$0xf] }
  0x56   : > { %v685_v12 = vsel %vm4564_vm4, %v680_v2, %v684_v20  ;;  %v708_v41 = vrot.slane %v706_v37, 5  ;;  %v712_v43 = vrot.slane %v710_v0, 4  ;;  %v716_v35 = vshll.u32 %v4916_v58, 16 }
  0x57   : > { %v695_v53 = vsel %vm4564_vm4, %v690_v40, %v694_v44  ;;  %v1384_v18 = vsel %vm4745_vm7, %v1382_v50, %v1383_v22  ;;  %v3428_v4 = vrot.slane %v4658_v13, 9  ;;  %v703_v2 = vor.u32 %v702_v59, %v699_v55 }
  0x58   : > { %v4937_v17 = vcombine.low %v685_v12, %v695_v53  ;;  %v4939_v20 = vcombine.low %v1381_v5, %v1384_v18  ;;  %v713_v19 = vor.u32 %v712_v43, %v708_v41  ;;  %v718_v37 = vrot.slane %v716_v35, 5  ;;  %v4949_v18 = vld [vmem:[%s4517_s27 + $0xb0] sm:$0x1] }
  0x59   : > { %v1387_v0 = vrot.slane %v4665_v24, 5  ;;  %v1390_v44 = vrot.slane %v4682_v8, 5  ;;  %v721_v22 = vshrl.u32 %v4926_v25, 16  ;;  %v704_v53 = vrot.slane %v703_v2, 4 }
  0x5a   : > { %5587 = vst [vmem:[#allocation19_spill] sm:$0xff] %v4937_v17  ;;  %5588 = vst [vmem:[#allocation20_spill] sm:$0xff] %v4939_v20  ;;  %3829 = vmatprep.mubr.msk.bf16.mxu1 %vm818_vm3, %v4937_v17  ;;  %3983 = vmatprep.mubr.msk.bf16.mxu0 %vm818_vm3, %v4939_v20  ;;  %v714_v40 = vrot.slane %v713_v19, 4  ;;  %v724_v43 = vshll.u32 %v4926_v25, 16  ;;  %v730_v5 = vshll.u32 %v4935_v32, 16  ;;  %v734_v12 = vshrl.u32 %v4935_v32, 16 }
  0x5b   : > { %v1388_v8 = vsel %vm4745_vm7, %v3428_v4, %v1387_v0  ;;  %v1389_v50 = vrot.slane %v1387_v0, 4  ;;  %v723_v55 = vrot.slane %v721_v22, 4  ;;  %v709_v59 = vsel %vm4564_vm4, %v704_v53, %v708_v41  ;;  %v4961_v17 = vld [vmem:[%s4517_s27 + $0xb4] sm:$0xf]  ;;  %v4973_v53 = vld [vmem:[%s4517_s27 + $0xb8] sm:$0xf] }
  0x5c   : > { %v719_v35 = vsel %vm4564_vm4, %v714_v40, %v718_v37  ;;  %v726_v2 = vrot.slane %v724_v43, 5  ;;  %v732_v19 = vrot.slane %v730_v5, 5  ;;  %v736_v0 = vrot.slane %v734_v12, 4 }
  0x5d   : > { %v4963_v20 = vcombine.low %v709_v59, %v719_v35  ;;  %v1391_v4 = vsel %vm4745_vm7, %v1389_v50, %v1390_v44  ;;  %v740_v22 = vshll.u32 %v4949_v18, 16  ;;  %v3429_v41 = vrot.slane %v4687_v42, 9  ;;  %v4979_v44 = vld [vmem:[%s4517_s27 + $0xbc] sm:$0x1] }
  0x5e   : > { %v4968_v30 = vcombine.low %v1388_v8, %v1391_v4  ;;  %v727_v63 = vor.u32 %v726_v2, %v723_v55  ;;  %v1394_v37 = vrot.slane %v4692_v6, 5  ;;  %v737_v40 = vor.u32 %v736_v0, %v732_v19 }
  0x5f   : > { %5589 = vst [vmem:[#allocation21_spill] sm:$0xff] %v4963_v20  ;;  %3830 = vmatmul.mubr.msk.bf16.gmra.mrb[24].mxu1 %vm818_vm3, %v4963_v20  ;;  %v742_v43 = vrot.slane %v740_v22, 5  ;;  %v1397_v5 = vrot.slane %v4705_v11, 5  ;;  %v745_v50 = vshrl.u32 %v4961_v17, 16  ;;  %v748_v59 = vshll.u32 %v4961_v17, 16 }
  0x60   : > { %5590 = vst [vmem:[#allocation22_spill] sm:$0xff] %v4968_v30  ;;  %3984 = vmatmul.mubr.msk.bf16.gmra.mrb[8].mxu0 %vm818_vm3, %v4968_v30  ;;  %v728_v8 = vrot.slane %v727_v63, 4  ;;  %v1395_v55 = vsel %vm4745_vm7, %v3429_v41, %v1394_v37  ;;  %v1396_v12 = vrot.slane %v1394_v37, 4  ;;  %v738_v35 = vrot.slane %v737_v40, 4 }
  0x61   : > { %v747_v2 = vrot.slane %v745_v50, 4  ;;  %v754_v4 = vshll.u32 %v4973_v53, 16  ;;  %v758_v11 = vshrl.u32 %v4973_v53, 16  ;;  %v750_v20 = vrot.slane %v748_v59, 5 }
  0x62   : > { %v733_v0 = vsel %vm4564_vm4, %v728_v8, %v732_v19  ;;  %v1398_v22 = vsel %vm4745_vm7, %v1396_v12, %v1397_v5  ;;  %v764_v63 = vshll.u32 %v4979_v44, 16  ;;  %v743_v41 = vsel %vm4564_vm4, %v738_v35, %v742_v43 }
  0x63   : > { %v4996_v37 = vcombine.low %v1395_v55, %v1398_v22  ;;  %v756_v40 = vrot.slane %v754_v4, 5  ;;  %v760_v50 = vrot.slane %v758_v11, 4  ;;  %v4998_v30 = vcombine.low %v733_v0, %v743_v41 }
  0x64   : > { %v751_v21 = vor.u32 %v750_v20, %v747_v2  ;;  %v766_v45 = vrot.slane %v764_v63, 5  ;;  %v3430_v42 = vrot.slane %v4709_v15, 9  ;;  %v1401_v5 = vrot.slane %v4714_v27, 5 }
  0x65   : > { %3987 = vmatprep.mubr.msk.bf16.mxu0 %vm818_vm3, %v4996_v37  ;;  %v761_v19 = vor.u32 %v760_v50, %v756_v40  ;;  %v1404_v8 = vrot.slane %v4728_v47, 5  ;;  %v3431_v43 = vrot.slane %v4736_v54, 9  ;;  %3833 = vmatprep.mubr.msk.bf16.mxu1 %vm818_vm3, %v4998_v30  ;;  %v3390_v20 = vcombine.low %v4531_v9, %v4534_v10 }
  0x66   : > { %v752_v55 = vrot.slane %v751_v21, 4  ;;  %v1408_v12 = vrot.slane %v4752_v36, 5  ;;  %v1411_v59 = vrot.slane %v4765_v51, 5  ;;  %v1402_v2 = vsel %vm4745_vm7, %v3430_v42, %v1401_v5 }
  0x67   : > { %v762_v35 = vrot.slane %v761_v19, 4  ;;  %v1403_v4 = vrot.slane %v1401_v5, 4  ;;  %v1415_v47 = vrot.slane %v4793_v31, 5  ;;  %v3432_v9 = vrot.slane %v4777_v56, 9 }
  0x68   : > { %v757_v11 = vsel %vm4564_vm4, %v752_v55, %v756_v40  ;;  %v1409_v21 = vsel %vm4745_vm7, %v3431_v43, %v1408_v12  ;;  %v1410_v0 = vrot.slane %v1408_v12, 4  ;;  %v1418_v42 = vrot.slane %v4798_v49, 5 }
  0x69   : > { %v767_v10 = vsel %vm4564_vm4, %v762_v35, %v766_v45  ;;  %v1405_v51 = vsel %vm4745_vm7, %v1403_v4, %v1404_v8  ;;  %v1417_v22 = vrot.slane %v1415_v47, 4  ;;  %v3433_v19 = vrot.slane %v4824_v29, 9 }
  0x6a   : > { %v5025_v63 = vcombine.low %v757_v11, %v767_v10  ;;  %v5027_v41 = vcombine.low %v1402_v2, %v1405_v51  ;;  %v1412_v40 = vsel %vm4745_vm7, %v1410_v0, %v1411_v59  ;;  %v1422_v5 = vrot.slane %v4830_v16, 5 }
  0x6b   : > { %v5031_v50 = vcombine.low %v1409_v21, %v1412_v40  ;;  %v1425_v49 = vrot.slane %v4840_v1, 5  ;;  %v1416_v45 = vsel %vm4745_vm7, %v3432_v9, %v1415_v47  ;;  %v1419_v8 = vsel %vm4745_vm7, %v1417_v22, %v1418_v42 }
  0x6c   : > { %3834 = vmatmul.mubr.msk.bf16.gmra.mrb[28].mxu1 %vm818_vm3, %v5025_v63  ;;  %3988 = vmatmul.mubr.msk.bf16.gmra.mrb[12].mxu0 %vm818_vm3, %v5027_v41  ;;  %v1424_v43 = vrot.slane %v1422_v5, 4  ;;  %v1429_v55 = vrot.slane %v4873_v46, 5  ;;  %v1436_v12 = vrot.slane %v4903_v7, 5  ;;  %v1423_v59 = vsel %vm4745_vm7, %v3433_v19, %v1422_v5 }
  0x6d   : > { %3839 = vmatprep.mubr.msk.bf16.mxu1 %vm818_vm3, %v3390_v20  ;;  %3991 = vmatprep.mubr.msk.bf16.mxu0 %vm818_vm3, %v5031_v50  ;;  %v5053_v20 = vcombine.low %v1416_v45, %v1419_v8  ;;  %v3434_v35 = vrot.slane %v4854_v61, 9  ;;  %v1432_v4 = vrot.slane %v4878_v3, 5  ;;  %v5059_v47 = vcombine.low %v4560_v33, %v4573_v39  ;;  %v5071_v3 = vld [vmem:[%s5533_s2 + $0x6] sm:$0x3] }
  0x6e   : > { %v1426_v1 = vsel %vm4745_vm7, %v1424_v43, %v1425_v49  ;;  %v1431_v2 = vrot.slane %v1429_v55, 4  ;;  %v3435_v11 = vrot.slane %v4896_v60, 9  ;;  %v1554_v21 = vsel %vm867_vm0, %v4613_v23, 0 }
  0x6f   : > { %v5064_v0 = vcombine.low %v1423_v59, %v1426_v1  ;;  %v1438_v9 = vrot.slane %v1436_v12, 4  ;;  %v1439_v10 = vrot.slane %v4916_v58, 5  ;;  %v1443_v51 = vrot.slane %v4935_v32, 5 }
  0x70   : > { %v1430_v33 = vsel %vm4745_vm7, %v3434_v35, %v1429_v55  ;;  %v1433_v39 = vsel %vm4745_vm7, %v1431_v2, %v1432_v4  ;;  %v5087_v23 = vcombine.low %v4587_v57, %v4592_v62  ;;  %v1437_v58 = vsel %vm4745_vm7, %v3435_v11, %v1436_v12 }
  0x71   : > { %v5093_v22 = vcombine.low %v4709_v15, %v4714_v27  ;;  %v1440_v42 = vsel %vm4745_vm7, %v1438_v9, %v1439_v10  ;;  %v3436_v40 = vrot.slane %v4926_v25, 9  ;;  %v1450_v19 = vrot.slane %v4973_v53, 5 }
  0x72   : > { %v5103_v57 = vcombine.low %v4736_v54, %v4752_v36  ;;  %v5107_v62 = vcombine.low %v1430_v33, %v1433_v39  ;;  %v1445_v15 = vrot.slane %v1443_v51, 4  ;;  %v1446_v27 = vrot.slane %v4949_v18, 5 }
  0x73   : > { %v5117_v5 = vcombine.low %v4777_v56, %v4793_v31  ;;  %v5121_v54 = vcombine.low %v4824_v29, %v4830_v16  ;;  %v5125_v36 = vcombine.low %v4854_v61, %v4873_v46  ;;  %v5129_v18 = vcombine.low %v4896_v60, %v4903_v7  ;;  %v5148_v61 = vld [vmem:[%s5113_s16 + $0x4] sm:$0xf] }
  0x74   : > { %3840 = vmatmul.mubr.msk.bf16.vlgmr.msra.gmra.mrb[0].mxu1 %vm818_vm3, %v4570_v38  ;;  %3992 = vmatmul.mubr.msk.bf16.gmra.mrb[16].mxu0 %vm818_vm3, %v5053_v20  ;;  %v5133_v49 = vcombine.low %v4926_v25, %v4935_v32  ;;  %v5137_v56 = vcombine.low %v4606_v14, %v4618_v28  ;;  %v5139_v31 = vcombine.low %v1437_v58, %v1440_v42  ;;  %v3437_v16 = vrot.slane %v4961_v17, 9  ;;  %v5591_v42 = vld [vmem:[#allocation5_spill] sm:$0xff] }
  0x75   : > { %3872 = vmatpush3.bf16.msra.mxu1 %v1554_v21  ;;  %3843 = vmatprep.mubr.msk.bf16.mxu1 %vm818_vm3, %v5059_v47  ;;  %v5143_v29 = vcombine.low %v4961_v17, %v4973_v53  ;;  %v1452_v7 = vrot.slane %v1450_v19, 4  ;;  %v1453_v60 = vrot.slane %v4979_v44, 5  ;;  %v1444_v14 = vsel %vm4745_vm7, %v3436_v40, %v1443_v51  ;;  %v5168_v17 = vld [vmem:[%s5113_s16] sm:$0xf]  ;;  %v376_v53 = vld [vmem:[%s5113_s16 + $0x8] sm:$0x1] }
  0x76   : > { %3995 = vmatprep.mubr.msk.bf16.mxu0 %vm818_vm3, %v5064_v0  ;;  %4370 = vmatprep.subr.msk.bf16.mxu1 %vm867_vm0, %v5071_v3  ;;  %v1447_v28 = vsel %vm4745_vm7, %v1445_v15, %v1446_v27  ;;  %v2186_v25 = vrot.slane %v5148_v61, 5  ;;  %v1451_v46 = vsel %vm4745_vm7, %v3437_v16, %v1450_v19  ;;  %v5173_v44 = vcombine.low %v4633_v48, %v4641_v52 }
  0x77   : > { %v1454_v32 = vsel %vm4745_vm7, %v1452_v7, %v1453_v60  ;;  %v5175_v45 = vcombine.low %v1444_v14, %v1447_v28  ;;  %v5179_v8 = vcombine.low %v4658_v13, %v4665_v24  ;;  %v1956_v43 = vshrl.u32 %v5168_v17, 16  ;;  %v3563_v60 = vld [vmem:[%s5533_s2 + $0x10] sm:$0x3]  ;;  %v4422_v14 = vld [vmem:[%s4517_s27 + $0x4] sm:$0xf] }
  0x78   : > { %v1959_v55 = vshll.u32 %v5168_v17, 16  ;;  %v1965_v12 = vshll.u32 %v5148_v61, 16  ;;  %v1969_v59 = vshrl.u32 %v5148_v61, 16  ;;  %v5185_v1 = vcombine.low %v1451_v46, %v1454_v32  ;;  %v4424_v32 = vld [vmem:[%s4517_s27] sm:$0xf] }
  0x79   : > { %v3507_v35 = vrot.slane %v5168_v17, 9  ;;  %v2188_v48 = vrot.slane %v2186_v25, 4  ;;  %v2189_v52 = vrot.slane %v376_v53, 5  ;;  %v1958_v2 = vrot.slane %v1956_v43, 4 }
  0x7a   : > { %v1961_v4 = vrot.slane %v1959_v55, 5  ;;  %v1967_v11 = vrot.slane %v1965_v12, 5  ;;  %v1971_v21 = vrot.slane %v1969_v59, 4  ;;  %v1975_v9 = vshll.u32 %v376_v53, 16 }
  0x7b   : > { %v2187_v10 = vsel %vm4745_vm7, %v3507_v35, %v2186_v25  ;;  %v2190_v51 = vsel %vm4745_vm7, %v2188_v48, %v2189_v52  ;;  %v5202_v40 = vcombine.low %v5591_v42, %v4692_v6  ;;  %v5592_v6 = vld [vmem:[#allocation15_spill] sm:$0xff]  ;;  %v1345_v28 = vrot.slane %v4422_v14, 5  ;;  %v5593_v48 = vld [vmem:[#allocation10_spill] sm:$0xff]  ;;  %v5594_v52 = vld [vmem:[#allocation12_spill] sm:$0xff] }
  0x7c   : > { %3844 = vmatmul.mubr.msk.bf16.gmra.mrb[4].mxu1 %vm818_vm3, %v5087_v23  ;;  %3996 = vmatmul.mubr.msk.bf16.gmra.mrb[20].mxu0 %vm818_vm3, %v5107_v62  ;;  %v1962_v13 = vor.u32 %v1961_v4, %v1958_v2  ;;  %v1972_v24 = vor.u32 %v1971_v21, %v1967_v11  ;;  %v1977_v58 = vrot.slane %v1975_v9, 5  ;;  %v5204_v19 = vcombine.low %v2187_v10, %v2190_v51  ;;  %v4423_v25 = vld [vmem:[%s4517_s27 + $0x8] sm:$0x1]  ;;  %v5596_v4 = vld [vmem:[#allocation17_spill] sm:$0xff]  ;;  %v5597_v21 = vld [vmem:[#allocation20_spill] sm:$0xff] }
  0x7d   : > { %3847 = vmatprep.mubr.msk.bf16.mxu1 %vm818_vm3, %v5137_v56  ;;  %3999 = vmatprep.mubr.msk.bf16.mxu0 %vm818_vm3, %v5139_v31  ;;  %v2634_v7 = vsel %vm867_vm0, %v5592_v6, 0  ;;  %v1348_v46 = vrot.slane %v4423_v25, 5  ;;  %v3422_v53 = vrot.slane %v4424_v32, 9  ;;  %v1347_v43 = vrot.slane %v1345_v28, 4  ;;  %v4425_v2 = vld [vmem:[%s5533_s2 + $0x8] sm:$0x3] }
  0x7e   : > { %v1963_v33 = vrot.slane %v1962_v13, 4  ;;  %v1973_v39 = vrot.slane %v1972_v24, 4  ;;  %v1760_v35 = vsel %vm867_vm0, %v5071_v3, 0  ;;  %v5595_v3 = vld [vmem:[#allocation14_spill] sm:$0xff]  ;;  %v5299_v24 = vld [vmem:[%s5113_s16 + $0xc] sm:$0xf] }
  0x7f   : > { %v1346_v55 = vsel %vm4745_vm7, %v3422_v53, %v1345_v28  ;;  %v1349_v12 = vsel %vm4745_vm7, %v1347_v43, %v1348_v46  ;;  %v5598_v13 = vld [vmem:[#allocation22_spill] sm:$0xff]  ;;  %v5302_v9 = vld [vmem:[%s5113_s16 + $0x10] sm:$0xf]  ;;  %v2846_v10 = vsel %vm867_vm0, %v3563_v60, 0  ;;  %v5604_v42 = vld [vmem:[#allocation9_spill] sm:$0xff]  ;;  %v2605_v14 = vshll.u32 %v5299_v24, 16 }
  0x80   : > { %v1968_v15 = vsel %vm4564_vm4, %v1963_v33, %v1967_v11  ;;  %v1978_v27 = vsel %vm4564_vm4, %v1973_v39, %v1977_v58  ;;  %v3439_v59 = vcombine.low %v1346_v55, %v1349_v12  ;;  %v5288_v11 = vcombine.low %v5168_v17, %v5148_v61  ;;  %v5599_v17 = vld [vmem:[#allocation3_spill] sm:$0xff]  ;;  %v5600_v51 = vld [vmem:[#allocation4_spill] sm:$0xff]  ;;  %v5601_v33 = vld [vmem:[#allocation6_spill] sm:$0xff] }
  0x81   : > { %v5210_v16 = vcombine.low %v1968_v15, %v1978_v27  ;;  %v3527_v61 = vcombine.low %v5299_v24, %v5302_v9  ;;  %v5602_v39 = vld [vmem:[#allocation7_spill] sm:$0xff]  ;;  %v5603_v58 = vld [vmem:[#allocation8_spill] sm:$0xff]  ;;  %v5606_v27 = vld [vmem:[#allocation13_spill] sm:$0xff]  ;;  %v2615_v28 = vshrl.u32 %v5302_v9, 16  ;;  %v2607_v32 = vrot.slane %v2605_v14, 5 }
  0x82   : > { %v5605_v15 = vld [vmem:[#allocation11_spill] sm:$0xff]  ;;  %v5607_v6 = vld [vmem:[#allocation16_spill] sm:$0xff]  ;;  %v5609_v25 = vld [vmem:[#allocation2_spill] sm:$0xff]  ;;  %v2832_v34 = vrot.slane %v5302_v9, 5 }
  0x83   : > { %v5610_v46 = vld [vmem:[#allocation19_spill] sm:$0xff]  ;;  %v2617_v43 = vrot.slane %v2615_v28, 4  ;;  %v379_v55 = vld [vmem:[%s5113_s16 + $0x14] sm:$0x1]  ;;  %v5611_v12 = vld [vmem:[#allocation21_spill] sm:$0xff] }
  0x84   : > { %3848 = vmatmul.mubr.msk.bf16.gmra.mrb[8].mxu1 %vm818_vm3, %v5173_v44  ;;  %4000 = vmatmul.mubr.msk.bf16.gmra.mrb[24].mxu0 %vm818_vm3, %v5175_v45 }
  0x85   : > { %3851 = vmatprep.mubr.msk.bf16.mxu1 %vm818_vm3, %v5179_v8  ;;  %4003 = vmatprep.mubr.msk.bf16.mxu0 %vm818_vm3, %v5185_v1 }
  0x8c   : > { %3852 = vmatmul.mubr.msk.bf16.gmra.mrb[12].mxu1 %vm818_vm3, %v5202_v40  ;;  %4004 = vmatmul.mubr.msk.bf16.gmra.mrb[28].mxu0 %vm818_vm3, %v5204_v19 }
  0x8d   : > { %3855 = vmatprep.mubr.msk.bf16.mxu1 %vm818_vm3, %v5093_v22  ;;  %4009 = vmatprep.mubr.msk.bf16.mxu0 %vm818_vm3, %v5059_v47 }
  0x94   : > { %3856 = vmatmul.mubr.msk.bf16.gmra.mrb[16].mxu1 %vm818_vm3, %v5103_v57  ;;  %4010 = vmatmul.mubr.msk.bf16.vlgmr.msra.gmra.mrb[0].mxu0 %vm818_vm3, %v5087_v23 }
  0x95   : > { %4042 = vmatpush3.bf16.msra.mxu0 %v2634_v7  ;;  %3859 = vmatprep.mubr.msk.bf16.mxu1 %vm818_vm3, %v5117_v5  ;;  %v5608_v7 = vld [vmem:[#allocation18_spill] sm:$0xff] }
  0x96   : > { %4013 = vmatprep.mubr.msk.bf16.mxu0 %vm818_vm3, %v5137_v56  ;;  %4376 = vmatprep.subr.msk.bf16.mxu0 %vm867_vm0, %v3563_v60  ;;  %v2602_v60 = vshrl.u32 %v5299_v24, 16 }
  0x9c   : > { %3860 = vmatmul.mubr.msk.bf16.gmra.mrb[20].mxu1 %vm818_vm3, %v5121_v54  ;;  %4014 = vmatmul.mubr.msk.bf16.gmra.mrb[4].mxu0 %vm818_vm3, %v5173_v44 }
  0x9d   : > { %3863 = vmatprep.mubr.msk.bf16.mxu1 %vm818_vm3, %v5125_v36  ;;  %4017 = vmatprep.mubr.msk.bf16.mxu0 %vm818_vm3, %v5179_v8 }
  0xa4   : > { %3864 = vmatmul.mubr.msk.bf16.gmra.mrb[24].mxu1 %vm818_vm3, %v5129_v18  ;;  %4018 = vmatmul.mubr.msk.bf16.gmra.mrb[8].mxu0 %vm818_vm3, %v5202_v40 }
  0xa5   : > { %3867 = vmatprep.mubr.msk.bf16.mxu1 %vm818_vm3, %v5133_v49  ;;  %4021 = vmatprep.mubr.msk.bf16.mxu0 %vm818_vm3, %v5093_v22 }
  0xac   : > { %3868 = vmatmul.mubr.msk.bf16.gmra.mrb[28].mxu1 %vm818_vm3, %v5143_v29  ;;  %4022 = vmatmul.mubr.msk.bf16.gmra.mrb[12].mxu0 %vm818_vm3, %v5103_v57 }
  0xad   : > { %3873 = vmatprep.mubr.msk.bf16.mxu1 %vm818_vm3, %v3439_v59  ;;  %4025 = vmatprep.mubr.msk.bf16.mxu0 %vm818_vm3, %v5117_v5 }
  0xb4   : > { %3874 = vmatmul.mubr.msk.bf16.vlgmr.msra.gmra.mrb[0].mxu1 %vm818_vm3, %v5593_v48  ;;  %4026 = vmatmul.mubr.msk.bf16.gmra.mrb[16].mxu0 %vm818_vm3, %v5121_v54 }
  0xb5   : > { %3906 = vmatpush3.bf16.msra.mxu1 %v1760_v35  ;;  %3877 = vmatprep.mubr.msk.bf16.mxu1 %vm818_vm3, %v5594_v52  ;;  %v2621_v35 = vshll.u32 %v379_v55, 16 }
  0xb6   : > { %4029 = vmatprep.mubr.msk.bf16.mxu0 %vm818_vm3, %v5125_v36  ;;  %4372 = vmatprep.subr.msk.bf16.mxu1 %vm867_vm0, %v4425_v2 }
  0xbc   : > { %3878 = vmatmul.mubr.msk.bf16.gmra.mrb[4].mxu1 %vm818_vm3, %v5595_v3  ;;  %4030 = vmatmul.mubr.msk.bf16.gmra.mrb[20].mxu0 %vm818_vm3, %v5129_v18 }
  0xbd   : > { %3881 = vmatprep.mubr.msk.bf16.mxu1 %vm818_vm3, %v5596_v4  ;;  %4033 = vmatprep.mubr.msk.bf16.mxu0 %vm818_vm3, %v5133_v49 }
  0xc4   : > { %3882 = vmatmul.mubr.msk.bf16.gmra.mrb[8].mxu1 %vm818_vm3, %v5597_v21  ;;  %4034 = vmatmul.mubr.msk.bf16.gmra.mrb[24].mxu0 %vm818_vm3, %v5143_v29 }
  0xc5   : > { %3885 = vmatprep.mubr.msk.bf16.mxu1 %vm818_vm3, %v5598_v13  ;;  %4037 = vmatprep.mubr.msk.bf16.mxu0 %vm818_vm3, %v5288_v11 }
  0xcc   : > { %3886 = vmatmul.mubr.msk.bf16.gmra.mrb[12].mxu1 %vm818_vm3, %v4996_v37  ;;  %4038 = vmatmul.mubr.msk.bf16.gmra.mrb[28].mxu0 %vm818_vm3, %v3527_v61  ;;  %v2623_v61 = vrot.slane %v2621_v35, 5 }
  0xcd   : > { %3889 = vmatprep.mubr.msk.bf16.mxu1 %vm818_vm3, %v5027_v41  ;;  %4043 = vmatprep.mubr.msk.bf16.mxu0 %vm818_vm3, %v5599_v17 }
  0xd4   : > { %3890 = vmatmul.mubr.msk.bf16.gmra.mrb[16].mxu1 %vm818_vm3, %v5031_v50  ;;  %4044 = vmatmul.mubr.msk.bf16.vlgmr.msra.gmra.mrb[0].mxu0 %vm818_vm3, %v5600_v51 }
  0xd5   : > { %4076 = vmatpush3.bf16.msra.mxu0 %v2846_v10  ;;  %3893 = vmatprep.mubr.msk.bf16.mxu1 %vm818_vm3, %v5053_v20 }
  0xd6   : > { %4047 = vmatprep.mubr.msk.bf16.mxu0 %vm818_vm3, %v5601_v33 }
  0xdc   : > { %3894 = vmatmul.mubr.msk.bf16.gmra.mrb[20].mxu1 %vm818_vm3, %v5064_v0  ;;  %4048 = vmatmul.mubr.msk.bf16.gmra.mrb[4].mxu0 %vm818_vm3, %v5602_v39 }
  0xdd   : > { %3897 = vmatprep.mubr.msk.bf16.mxu1 %vm818_vm3, %v5107_v62  ;;  %4051 = vmatprep.mubr.msk.bf16.mxu0 %vm818_vm3, %v5603_v58 }
  0xe4   : > { %3898 = vmatmul.mubr.msk.bf16.gmra.mrb[24].mxu1 %vm818_vm3, %v5139_v31  ;;  %4052 = vmatmul.mubr.msk.bf16.gmra.mrb[8].mxu0 %vm818_vm3, %v5604_v42 }
  0xe5   : > { %3901 = vmatprep.mubr.msk.bf16.mxu1 %vm818_vm3, %v5175_v45  ;;  %4055 = vmatprep.mubr.msk.bf16.mxu0 %vm818_vm3, %v5605_v15 }
  0xec   : > { %3902 = vmatmul.mubr.msk.bf16.gmra.mrb[28].mxu1 %vm818_vm3, %v5185_v1  ;;  %4056 = vmatmul.mubr.msk.bf16.gmra.mrb[12].mxu0 %vm818_vm3, %v5606_v27 }
  0xed   : > { %3907 = vmatprep.mubr.msk.bf16.mxu1 %vm818_vm3, %v4570_v38  ;;  %4059 = vmatprep.mubr.msk.bf16.mxu0 %vm818_vm3, %v5607_v6  ;;  %v2611_v38 = vshll.u32 %v5302_v9, 16 }
  0xef   : > { %v2613_v53 = vrot.slane %v2611_v38, 5 }
  0xf1   : > { %v2618_v59 = vor.u32 %v2617_v43, %v2613_v53 }
  0xf3   : > { %v2619_v2 = vrot.slane %v2618_v59, 4 }
  0xf4   : > { %3908 = vmatmul.mubr.msk.bf16.vlgmr.msra.gmra.mrb[0].mxu1 %vm818_vm3, %v5059_v47  ;;  %4060 = vmatmul.mubr.msk.bf16.gmra.mrb[16].mxu0 %vm818_vm3, %v5608_v7  ;;  %v2604_v47 = vrot.slane %v2602_v60, 4 }
  0xf5   : > { %4110 = vmatpush3.bf16.msra.mxu1 %v5609_v25  ;;  %3911 = vmatprep.mubr.msk.bf16.mxu1 %vm818_vm3, %v5087_v23 }
  0xf6   : > { %4063 = vmatprep.mubr.msk.bf16.mxu0 %vm818_vm3, %v5610_v46  ;;  %v2608_v23 = vor.u32 %v2607_v32, %v2604_v47 }
  0xf8   : > { %v2609_v48 = vrot.slane %v2608_v23, 4 }
  0xfc   : > { %3912 = vmatmul.mubr.msk.bf16.gmra.mrb[4].mxu1 %vm818_vm3, %v5137_v56  ;;  %4064 = vmatmul.mubr.msk.bf16.gmra.mrb[20].mxu0 %vm818_vm3, %v5611_v12  ;;  %v2614_v56 = vsel %vm4564_vm4, %v2609_v48, %v2613_v53 }
  0xfd   : > { %3915 = vmatprep.mubr.msk.bf16.mxu1 %vm818_vm3, %v5173_v44  ;;  %4067 = vmatprep.mubr.msk.bf16.mxu0 %vm818_vm3, %v4998_v30  ;;  %v2624_v44 = vsel %vm4564_vm4, %v2619_v2, %v2623_v61 }
  0xfe   : > { %v3545_v17 = vcombine.low %v2614_v56, %v2624_v44 }
 0x104   : > { %3916 = vmatmul.mubr.msk.bf16.gmra.mrb[8].mxu1 %vm818_vm3, %v5179_v8  ;;  %4068 = vmatmul.mubr.msk.bf16.gmra.mrb[24].mxu0 %vm818_vm3, %v5025_v63 }
 0x105   : > { %3919 = vmatprep.mubr.msk.bf16.mxu1 %vm818_vm3, %v5202_v40  ;;  %4071 = vmatprep.mubr.msk.bf16.mxu0 %vm818_vm3, %v5210_v16 }
 0x10c   : > { %3920 = vmatmul.mubr.msk.bf16.gmra.mrb[12].mxu1 %vm818_vm3, %v5093_v22  ;;  %4072 = vmatmul.mubr.msk.bf16.gmra.mrb[28].mxu0 %vm818_vm3, %v3545_v17 }
 0x10d   : > { %3923 = vmatprep.mubr.msk.bf16.mxu1 %vm818_vm3, %v5103_v57  ;;  %4077 = vmatprep.mubr.msk.bf16.mxu0 %vm818_vm3, %v5594_v52 }
 0x114   : > { %3924 = vmatmul.mubr.msk.bf16.gmra.mrb[16].mxu1 %vm818_vm3, %v5117_v5  ;;  %4078 = vmatmul.mubr.msk.bf16.vlgmr.msra.gmra.mrb[0].mxu0 %vm818_vm3, %v5595_v3 }
 0x115   : > { %3927 = vmatprep.mubr.msk.bf16.mxu1 %vm818_vm3, %v5121_v54  ;;  %4081 = vmatprep.mubr.msk.bf16.mxu0 %vm818_vm3, %v5596_v4 }
 0x11c   : > { %3928 = vmatmul.mubr.msk.bf16.gmra.mrb[20].mxu1 %vm818_vm3, %v5125_v36  ;;  %4082 = vmatmul.mubr.msk.bf16.gmra.mrb[4].mxu0 %vm818_vm3, %v5597_v21 }
 0x11d   : > { %3931 = vmatprep.mubr.msk.bf16.mxu1 %vm818_vm3, %v5129_v18  ;;  %4085 = vmatprep.mubr.msk.bf16.mxu0 %vm818_vm3, %v5598_v13 }
 0x124   : > { %3932 = vmatmul.mubr.msk.bf16.gmra.mrb[24].mxu1 %vm818_vm3, %v5133_v49  ;;  %4086 = vmatmul.mubr.msk.bf16.gmra.mrb[8].mxu0 %vm818_vm3, %v4996_v37  ;;  %v3562_v37 = vrot.slane %v5299_v24, 9 }
 0x125   : > { %3935 = vmatprep.mubr.msk.bf16.mxu1 %vm818_vm3, %v5143_v29  ;;  %4089 = vmatprep.mubr.msk.bf16.mxu0 %vm818_vm3, %v5027_v41  ;;  %v2834_v41 = vrot.slane %v2832_v34, 4 }
 0x12c   : > { %3936 = vmatmul.mubr.msk.bf16.gmra.mrb[28].mxu1 %vm818_vm3, %v5288_v11  ;;  %4090 = vmatmul.mubr.msk.bf16.gmra.mrb[12].mxu0 %vm818_vm3, %v5031_v50  ;;  %v2835_v50 = vrot.slane %v379_v55, 5 }
 0x12d   : > { %3957 = vmatprep.mubr.msk.bf16.mxu1 %vm818_vm3, %v5606_v27  ;;  %4093 = vmatprep.mubr.msk.bf16.mxu0 %vm818_vm3, %v5053_v20  ;;  %v2833_v20 = vsel %vm4745_vm7, %v3562_v37, %v2832_v34 }
 0x134   : > { %3958 = vmatmul.mubr.msk.bf16.vlgmr.msra.gmra.mrb[16].mxu1 %vm818_vm3, %v5607_v6  ;;  %4094 = vmatmul.mubr.msk.bf16.gmra.mrb[16].mxu0 %vm818_vm3, %v5064_v0  ;;  %v2836_v0 = vsel %vm4745_vm7, %v2834_v41, %v2835_v50 }
 0x135   : > { %3961 = vmatprep.mubr.msk.bf16.mxu1 %vm818_vm3, %v5608_v7  ;;  %4097 = vmatprep.mubr.msk.bf16.mxu0 %vm818_vm3, %v5107_v62  ;;  %v3564_v22 = vcombine.low %v2833_v20, %v2836_v0 }
 0x13c   : > { %3962 = vmatmul.mubr.msk.bf16.gmra.mrb[20].mxu1 %vm818_vm3, %v5610_v46  ;;  %4098 = vmatmul.mubr.msk.bf16.gmra.mrb[20].mxu0 %vm818_vm3, %v5139_v31 }
 0x13d   : > { %3965 = vmatprep.mubr.msk.bf16.mxu1 %vm818_vm3, %v5611_v12  ;;  %4101 = vmatprep.mubr.msk.bf16.mxu0 %vm818_vm3, %v5175_v45 }
 0x144   : > { %3966 = vmatmul.mubr.msk.bf16.gmra.mrb[24].mxu1 %vm818_vm3, %v4998_v30  ;;  %4102 = vmatmul.mubr.msk.bf16.gmra.mrb[24].mxu0 %vm818_vm3, %v5185_v1 }
 0x145   : > { %3969 = vmatprep.mubr.msk.bf16.mxu1 %vm818_vm3, %v5025_v63  ;;  %4105 = vmatprep.mubr.msk.bf16.mxu0 %vm818_vm3, %v5204_v19 }
 0x14c   : > { %3970 = vmatmul.mubr.msk.bf16.gmra.mrb[28].mxu1 %vm818_vm3, %v5210_v16  ;;  %4106 = vmatmul.mubr.msk.bf16.gmra.mrb[28].mxu0 %vm818_vm3, %v3564_v22 }
 0x1c7   : > { %v3909_v30 = vpop.f32.mrb[0].mxu1 }
 0x1c8   : > { %v1796_v57 = vpop.f32.mrb[1].mxu1 }
 0x1c9   : > { %v3910_v62 = vpop.f32.mrb[2].mxu1 }
 0x1ca   : > { %v1799_v63 = vpop.f32.mrb[3].mxu1 }
 0x1cf   : > { %v3913_v5 = vpop.f32.mrb[4].mxu1 }
 0x1d0   : > { %v1812_v54 = vpop.f32.mrb[5].mxu1 }
 0x1d1   : > { %v3914_v36 = vpop.f32.mrb[6].mxu1 }
 0x1d2   : > { %v1815_v18 = vpop.f32.mrb[7].mxu1 }
 0x1d7   : > { %v3917_v49 = vpop.f32.mrb[8].mxu1 }
 0x1d8   : > { %v1828_v31 = vpop.f32.mrb[9].mxu1 }
 0x1d9   : > { %v3918_v29 = vpop.f32.mrb[10].mxu1 }
 0x1da   : > { %v1831_v26 = vpop.f32.mrb[11].mxu1 }
 0x1df   : > { %v3921_v45 = vpop.f32.mrb[12].mxu1 }
 0x1e0   : > { %v1844_v8 = vpop.f32.mrb[13].mxu1 }
 0x1e1   : > { %v3922_v1 = vpop.f32.mrb[14].mxu1 }
 0x1e2   : > { %v1847_v40 = vpop.f32.mrb[15].mxu1 }
 0x1e7   : > { %v4079_v19 = vpop.f32.mrb[0].mxu0 }
 0x1e8   : > { %v4111_v16 = vadd.f32 %v4079_v19, %v3909_v30  ;;  %v2882_v52 = vpop.f32.mrb[1].mxu0 }
 0x1e9   : > { %v4112_v3 = vadd.f32 %v2882_v52, %v1796_v57  ;;  %v4080_v4 = vpop.f32.mrb[2].mxu0 }
 0x1ea   : > { %v3620_v11 = vpack.c.bf16 %v4111_v16, %v4111_v16  ;;  %v4113_v21 = vadd.f32 %v4080_v4, %v3910_v62  ;;  %v2885_v13 = vpop.f32.mrb[3].mxu0 }
 0x1eb   : > { %v3618_v24 = vpack.c.bf16 %v4112_v3, %v4112_v3  ;;  %v4114_v9 = vadd.f32 %v2885_v13, %v1799_v63 }
 0x1ec   : > { %3172 = vst.msk [vmem:[%s5456_s24 + $0x8] sm:$0xf] %vm3169_vm8, %v3620_v11  ;;  %v3621_v10 = vpack.c.bf16 %v4113_v21, %v4113_v21 }
 0x1ed   : > { %3170 = vst.msk [vmem:[%s5456_s24] sm:$0xf] %vm3169_vm8, %v3618_v24  ;;  %v3619_v51 = vpack.c.bf16 %v4114_v9, %v4114_v9 }
 0x1ee   : > { %3173 = vst.msk [vmem:[%s5456_s24 + $0xc] sm:$0xf] %vm3169_vm8, %v3621_v10 }
 0x1ef   : > { %3171 = vst.msk [vmem:[%s5456_s24 + $0x4] sm:$0xf] %vm3169_vm8, %v3619_v51  ;;  %v4083_v33 = vpop.f32.mrb[4].mxu0 }
 0x1f0   : > { %v4115_v39 = vadd.f32 %v4083_v33, %v3913_v5  ;;  %v2898_v58 = vpop.f32.mrb[5].mxu0 }
 0x1f1   : > { %v4116_v42 = vadd.f32 %v2898_v58, %v1812_v54  ;;  %v4084_v15 = vpop.f32.mrb[6].mxu0 }
 0x1f2   : > { %v3624_v27 = vpack.c.bf16 %v4115_v39, %v4115_v39  ;;  %v4117_v6 = vadd.f32 %v4084_v15, %v3914_v36  ;;  %v2901_v7 = vpop.f32.mrb[7].mxu0 }
 0x1f3   : > { %v3622_v60 = vpack.c.bf16 %v4116_v42, %v4116_v42  ;;  %v4118_v14 = vadd.f32 %v2901_v7, %v1815_v18 }
 0x1f4   : > { %3176 = vst.msk [vmem:[%s5456_s24 + $0x18] sm:$0xf] %vm3169_vm8, %v3624_v27  ;;  %v3625_v28 = vpack.c.bf16 %v4117_v6, %v4117_v6 }
 0x1f5   : > { %3174 = vst.msk [vmem:[%s5456_s24 + $0x10] sm:$0xf] %vm3169_vm8, %v3622_v60  ;;  %v3623_v25 = vpack.c.bf16 %v4118_v14, %v4118_v14 }
 0x1f6   : > { %3177 = vst.msk [vmem:[%s5456_s24 + $0x1c] sm:$0xf] %vm3169_vm8, %v3625_v28 }
 0x1f7   : > { %3175 = vst.msk [vmem:[%s5456_s24 + $0x14] sm:$0xf] %vm3169_vm8, %v3623_v25  ;;  %v4087_v38 = vpop.f32.mrb[8].mxu0 }
 0x1f8   : > { %v4119_v46 = vadd.f32 %v4087_v38, %v3917_v49  ;;  %v2914_v47 = vpop.f32.mrb[9].mxu0 }
 0x1f9   : > { %v4120_v32 = vadd.f32 %v2914_v47, %v1828_v31  ;;  %v4088_v53 = vpop.f32.mrb[10].mxu0 }
 0x1fa   : > { %v3628_v43 = vpack.c.bf16 %v4119_v46, %v4119_v46  ;;  %v4121_v55 = vadd.f32 %v4088_v53, %v3918_v29  ;;  %v2917_v12 = vpop.f32.mrb[11].mxu0 }
 0x1fb   : > { %v3626_v23 = vpack.c.bf16 %v4120_v32, %v4120_v32  ;;  %v4122_v59 = vadd.f32 %v2917_v12, %v1831_v26 }
 0x1fc   : > { %3180 = vst.msk [vmem:[%s5456_s24 + $0x28] sm:$0xf] %vm3169_vm8, %v3628_v43  ;;  %v3629_v35 = vpack.c.bf16 %v4121_v55, %v4121_v55 }
 0x1fd   : > { %3178 = vst.msk [vmem:[%s5456_s24 + $0x20] sm:$0xf] %vm3169_vm8, %v3626_v23  ;;  %v3627_v48 = vpack.c.bf16 %v4122_v59, %v4122_v59 }
 0x1fe   : > { %3181 = vst.msk [vmem:[%s5456_s24 + $0x2c] sm:$0xf] %vm3169_vm8, %v3629_v35 }
 0x1ff   : > { %3179 = vst.msk [vmem:[%s5456_s24 + $0x24] sm:$0xf] %vm3169_vm8, %v3627_v48  ;;  %v4091_v2 = vpop.f32.mrb[12].mxu0 }
 0x200   : > { %v4123_v61 = vadd.f32 %v4091_v2, %v3921_v45  ;;  %v2930_v56 = vpop.f32.mrb[13].mxu0 }
 0x201   : > { %v4124_v44 = vadd.f32 %v2930_v56, %v1844_v8  ;;  %v4092_v17 = vpop.f32.mrb[14].mxu0 }
 0x202   : > { %v3632_v34 = vpack.c.bf16 %v4123_v61, %v4123_v61  ;;  %v4125_v37 = vadd.f32 %v4092_v17, %v3922_v1  ;;  %v2933_v41 = vpop.f32.mrb[15].mxu0 }
 0x203   : > { %v3630_v50 = vpack.c.bf16 %v4124_v44, %v4124_v44  ;;  %v4126_v20 = vadd.f32 %v2933_v41, %v1847_v40 }
 0x204   : > { %3184 = vst.msk [vmem:[%s5456_s24 + $0x38] sm:$0xf] %vm3169_vm8, %v3632_v34  ;;  %v3633_v0 = vpack.c.bf16 %v4125_v37, %v4125_v37 }
 0x205   : > { %3182 = vst.msk [vmem:[%s5456_s24 + $0x30] sm:$0xf] %vm3169_vm8, %v3630_v50  ;;  %v3631_v22 = vpack.c.bf16 %v4126_v20, %v4126_v20 }
 0x206   : > { %3185 = vst.msk [vmem:[%s5456_s24 + $0x3c] sm:$0xf] %vm3169_vm8, %v3633_v0 }
 0x207   : > { %3183 = vst.msk [vmem:[%s5456_s24 + $0x34] sm:$0xf] %vm3169_vm8, %v3631_v22  ;;  %v3959_v30 = vpop.f32.mrb[16].mxu1  ;;  %v4095_v57 = vpop.f32.mrb[16].mxu0 }
 0x208   : > { %v4127_v62 = vadd.f32 %v4095_v57, %v3959_v30  ;;  %v2088_v63 = vpop.f32.mrb[17].mxu1  ;;  %v2946_v5 = vpop.f32.mrb[17].mxu0 }
 0x209   : > { %v4128_v54 = vadd.f32 %v2946_v5, %v2088_v63  ;;  %v3960_v36 = vpop.f32.mrb[18].mxu1  ;;  %v4096_v18 = vpop.f32.mrb[18].mxu0 }
 0x20a   : > { %v3636_v49 = vpack.c.bf16 %v4127_v62, %v4127_v62  ;;  %v4129_v31 = vadd.f32 %v4096_v18, %v3960_v36  ;;  %v2091_v29 = vpop.f32.mrb[19].mxu1  ;;  %v2949_v26 = vpop.f32.mrb[19].mxu0 }
 0x20b   : > { %v3634_v45 = vpack.c.bf16 %v4128_v54, %v4128_v54  ;;  %v4130_v8 = vadd.f32 %v2949_v26, %v2091_v29 }
 0x20c   : > { %3188 = vst.msk [vmem:[%s5456_s24 + $0x48] sm:$0xf] %vm3169_vm8, %v3636_v49  ;;  %v3637_v1 = vpack.c.bf16 %v4129_v31, %v4129_v31 }
 0x20d   : > { %3186 = vst.msk [vmem:[%s5456_s24 + $0x40] sm:$0xf] %vm3169_vm8, %v3634_v45  ;;  %v3635_v40 = vpack.c.bf16 %v4130_v8, %v4130_v8 }
 0x20e   : > { %3189 = vst.msk [vmem:[%s5456_s24 + $0x4c] sm:$0xf] %vm3169_vm8, %v3637_v1 }
 0x20f   : > { %3187 = vst.msk [vmem:[%s5456_s24 + $0x44] sm:$0xf] %vm3169_vm8, %v3635_v40  ;;  %v3963_v19 = vpop.f32.mrb[20].mxu1  ;;  %v4099_v16 = vpop.f32.mrb[20].mxu0 }
 0x210   : > { %v4131_v52 = vadd.f32 %v4099_v16, %v3963_v19  ;;  %v2104_v3 = vpop.f32.mrb[21].mxu1  ;;  %v2962_v4 = vpop.f32.mrb[21].mxu0 }
 0x211   : > { %v4132_v11 = vadd.f32 %v2962_v4, %v2104_v3  ;;  %v3964_v21 = vpop.f32.mrb[22].mxu1  ;;  %v4100_v13 = vpop.f32.mrb[22].mxu0 }
 0x212   : > { %v3640_v24 = vpack.c.bf16 %v4131_v52, %v4131_v52  ;;  %v4133_v9 = vadd.f32 %v4100_v13, %v3964_v21  ;;  %v2107_v10 = vpop.f32.mrb[23].mxu1  ;;  %v2965_v51 = vpop.f32.mrb[23].mxu0 }
 0x213   : > { %v3638_v33 = vpack.c.bf16 %v4132_v11, %v4132_v11  ;;  %v4134_v39 = vadd.f32 %v2965_v51, %v2107_v10 }
 0x214   : > { %3192 = vst.msk [vmem:[%s5456_s24 + $0x58] sm:$0xf] %vm3169_vm8, %v3640_v24  ;;  %v3641_v58 = vpack.c.bf16 %v4133_v9, %v4133_v9 }
 0x215   : > { %3190 = vst.msk [vmem:[%s5456_s24 + $0x50] sm:$0xf] %vm3169_vm8, %v3638_v33  ;;  %v3639_v42 = vpack.c.bf16 %v4134_v39, %v4134_v39 }
 0x216   : > { %3193 = vst.msk [vmem:[%s5456_s24 + $0x5c] sm:$0xf] %vm3169_vm8, %v3641_v58 }
 0x217   : > { %3191 = vst.msk [vmem:[%s5456_s24 + $0x54] sm:$0xf] %vm3169_vm8, %v3639_v42  ;;  %v3967_v15 = vpop.f32.mrb[24].mxu1  ;;  %v4103_v27 = vpop.f32.mrb[24].mxu0 }
 0x218   : > { %v4135_v6 = vadd.f32 %v4103_v27, %v3967_v15  ;;  %v2120_v7 = vpop.f32.mrb[25].mxu1  ;;  %v2978_v60 = vpop.f32.mrb[25].mxu0 }
 0x219   : > { %v4136_v14 = vadd.f32 %v2978_v60, %v2120_v7  ;;  %v3968_v28 = vpop.f32.mrb[26].mxu1  ;;  %v4104_v25 = vpop.f32.mrb[26].mxu0 }
 0x21a   : > { %v3644_v38 = vpack.c.bf16 %v4135_v6, %v4135_v6  ;;  %v4137_v46 = vadd.f32 %v4104_v25, %v3968_v28  ;;  %v2123_v47 = vpop.f32.mrb[27].mxu1  ;;  %v2981_v32 = vpop.f32.mrb[27].mxu0 }
 0x21b   : > { %v3642_v53 = vpack.c.bf16 %v4136_v14, %v4136_v14  ;;  %v4138_v43 = vadd.f32 %v2981_v32, %v2123_v47 }
 0x21c   : > { %3196 = vst.msk [vmem:[%s5456_s24 + $0x68] sm:$0xf] %vm3169_vm8, %v3644_v38  ;;  %v3645_v55 = vpack.c.bf16 %v4137_v46, %v4137_v46 }
 0x21d   : > { %3194 = vst.msk [vmem:[%s5456_s24 + $0x60] sm:$0xf] %vm3169_vm8, %v3642_v53  ;;  %v3643_v12 = vpack.c.bf16 %v4138_v43, %v4138_v43 }
 0x21e   : > { %3197 = vst.msk [vmem:[%s5456_s24 + $0x6c] sm:$0xf] %vm3169_vm8, %v3645_v55 }
 0x21f   : > { %3195 = vst.msk [vmem:[%s5456_s24 + $0x64] sm:$0xf] %vm3169_vm8, %v3643_v12  ;;  %v3971_v23 = vpop.f32.mrb[28].mxu1  ;;  %v4107_v59 = vpop.f32.mrb[28].mxu0 }
 0x220   : > { %v4139_v35 = vadd.f32 %v4107_v59, %v3971_v23  ;;  %v2136_v48 = vpop.f32.mrb[29].mxu1  ;;  %v2994_v2 = vpop.f32.mrb[29].mxu0 }
 0x221   : > { %v4140_v61 = vadd.f32 %v2994_v2, %v2136_v48  ;;  %v3972_v56 = vpop.f32.mrb[30].mxu1  ;;  %v4108_v44 = vpop.f32.mrb[30].mxu0 }
 0x222   : > { %v3648_v17 = vpack.c.bf16 %v4139_v35, %v4139_v35  ;;  %v4141_v34 = vadd.f32 %v4108_v44, %v3972_v56  ;;  %v2139_v37 = vpop.f32.mrb[31].mxu1  ;;  %v2997_v41 = vpop.f32.mrb[31].mxu0 }
 0x223   : > { %v3646_v50 = vpack.c.bf16 %v4140_v61, %v4140_v61  ;;  %v4142_v20 = vadd.f32 %v2997_v41, %v2139_v37 }
 0x224   : > { %3200 = vst.msk [vmem:[%s5456_s24 + $0x78] sm:$0xf] %vm3169_vm8, %v3648_v17  ;;  %v3649_v0 = vpack.c.bf16 %v4141_v34, %v4141_v34 }
 0x225   : > { %3198 = vst.msk [vmem:[%s5456_s24 + $0x70] sm:$0xf] %vm3169_vm8, %v3646_v50  ;;  %v3647_v22 = vpack.c.bf16 %v4142_v20, %v4142_v20 }
 0x226   : > { %3201 = vst.msk [vmem:[%s5456_s24 + $0x7c] sm:$0xf] %vm3169_vm8, %v3649_v0 }
 0x227   : > { %3199 = vst.msk [vmem:[%s5456_s24 + $0x74] sm:$0xf] %vm3169_vm8, %v3647_v22 }
 0x228 PF: > { %s13_s14 = sadd.s32 1, %s4448_s14   ;;  %s5612_s12 = smov %s4444_s13 }
 0x229   : > { %p10_p5 = scmp.ge.s32.totalorder %s13_s14, 4   ;;  %s5613_s13 = smov %s5615_s15 }
 0x22b   :  { %12 = sbr.rel (!%p10_p5) target bundleno = 2 (0x2), region = 76 }

</bundles_post_ra>
